<compile_context>
chip_gen: v5e
topology: v5e:2x2
jax: 0.10.0
libtpu: 0.0.40
codegen_flags: <defaults>
</compile_context>

<pallas_src>
import functools

import jax
import jax.numpy as jnp
from jax.experimental import pallas as pl
from jax.experimental.pallas import tpu as pltpu

MAX_PAD = 7                  # padding of the widest (kernel_size=15) branch
KWIN = 2 * MAX_PAD + 1       # 15-tap im2col window shared by all branches
TEMPERATURE = 2.0            # module's registered buffer (default value)
# TODO(synk): update_temperature() annealing and compute_load_balance_loss()
# are training-time utilities and are not modeled here.


def _round_up(n, m):
    return (n + m - 1) // m * m


def _blk(ref, off):
    """Static slice of one packed-parameter block out of a weight pack."""
    r0, nr, nc = off
    return ref[r0:r0 + nr, 0:nc]


def _pack_layout(input_size, hidden_size, num_experts):
    """Row offsets of every fused parameter block (depends only on sizes)."""
    F_, H = input_size, hidden_size
    H2, H4 = H // 2, H // 4
    w_blocks = [('wc',    (KWIN * F_,       3 * H2)),
                ('w_st1', (6 * F_,          H2 + H4)),
                ('w_st2', (H2 + H4,         2 * H4)),
                ('dw1r',  (3 * H2 + 2 * H4, H)),
                ('dw2',   (H,               H2)),
                ('dw3',   (H2,              num_experts))]
    b_blocks = [('bc',    (1, 3 * H2)),
                ('b_st1', (1, H2 + H4)),
                ('b_st2', (1, 2 * H4)),
                ('db1',   (1, H)),
                ('db2',   (1, H2)),
                ('db3',   (1, num_experts)),
                ('embc',  (2, H)),
                ('lb',    (2, num_experts))]

    def lay(blocks, align):
        offs, row = {}, 0
        width = max(nc for _, (_, nc) in blocks)
        for name, (nr, nc) in blocks:
            offs[name] = (row, nr, nc)
            row = _round_up(row + nr, align)
        return offs, (row, width)

    offs_w, wdims = lay(w_blocks, 16)   # bf16 pack: 16-row sublane groups
    offs_b, bdims = lay(b_blocks, 8)    # f32 pack: 8-row sublane groups
    return offs_w, wdims, offs_b, bdims


def _gating_kernel(B, L, F_, H2, H4, E, offs_w, offs_b,
                   task_ref, x_ref, wp_ref, bp_ref, out_ref):
    inv_L = 1.0 / float(L)
    # unbiased std (torch.std default). NOTE: torch gives NaN for L==1; we
    # clamp the denominator so the kernel returns 0 instead of NaN.
    inv_dn = 1.0 / float(max(L - 1, 1))

    # ---- 1. per-batch im2col + input statistics (all 2-D ops) --------------
    zpad = jnp.zeros((MAX_PAD, F_), jnp.float32)
    cols_rows, stat_rows = [], []
    for b in range(B):
        xb = x_ref[b].astype(jnp.float32)                     # [L, F]
        xpb = jnp.concatenate([zpad, xb, zpad], axis=0)       # [L+2*MAX_PAD, F]
        wins = [xpb[j:j + L, :] for j in range(KWIN)]         # KWIN x [L, F]
        cols_rows.append(jnp.concatenate(wins, axis=1))       # [L, KWIN*F]

        mb = jnp.sum(xb, axis=0, keepdims=True) * inv_L       # E[x]
        xc = xb - mb                                          # centered (f32)
        var = jnp.sum(xc * xc, axis=0, keepdims=True) * inv_dn
        stdb = jnp.sqrt(var)
        minb = jnp.min(xb, axis=0, keepdims=True)
        maxb = jnp.max(xb, axis=0, keepdims=True)
        # trend features (seq_len is static -> static branch, as in torch)
        if L >= 7:
            slope = (xb[L - 1:L, :] - xb[L - 7:L - 6, :]) * (1.0 / 7.0)
            if L >= 14:
                accel = (xb[L - 1:L, :] - 2.0 * xb[L - 7:L - 6, :]
                         + xb[L - 14:L - 13, :]) * (1.0 / 49.0)
            else:
                accel = jnp.zeros_like(slope)
        else:
            slope = jnp.zeros((1, F_), jnp.float32)
            accel = jnp.zeros((1, F_), jnp.float32)
        stat_rows.append(jnp.concatenate([mb, stdb, minb, maxb, slope, accel],
                                         axis=1))             # [1, 6F]
    cols = jnp.concatenate(cols_rows, axis=0)                  # [B*L, KWIN*F]
    st_in = jnp.concatenate(stat_rows, axis=0)                 # [B, 6F]

    # ---- 2. all three conv branches as ONE bf16 MXU matmul + ReLU ----------
    conv_y = jnp.maximum(
        jnp.dot(cols.astype(jnp.bfloat16), _blk(wp_ref, offs_w['wc']),
                preferred_element_type=jnp.float32)
        + _blk(bp_ref, offs_b['bc']), 0.0)                     # [B*L, 3*H2]
    conv_f = jnp.concatenate(
        [jnp.sum(conv_y[b * L:(b + 1) * L, :], axis=0, keepdims=True) * inv_L
         for b in range(B)], axis=0)                           # [B, 3*H2]

    # ---- 3. stats-MLP + trend-MLP fused block-diagonally (2 matmuls) -------
    # (Dropout layers are identity at inference.)
    h = jnp.maximum(
        jnp.dot(st_in.astype(jnp.bfloat16), _blk(wp_ref, offs_w['w_st1']),
                preferred_element_type=jnp.float32)
        + _blk(bp_ref, offs_b['b_st1']), 0.0)
    st_f = jnp.maximum(
        jnp.dot(h.astype(jnp.bfloat16), _blk(wp_ref, offs_w['w_st2']),
                preferred_element_type=jnp.float32)
        + _blk(bp_ref, offs_b['b_st2']), 0.0)    # [B, 2*H4] = [stat_f|trend_f]

    # ---- 4. task selection from the runtime SMEM scalar --------------------
    tid = task_ref[0]
    w0 = (tid == 0).astype(jnp.float32)          # 1.0 if task 0 else 0.0
    embc = _blk(bp_ref, offs_b['embc'])          # [2, H]  = emb @ dw1[task rows]
    task_h1 = embc[0:1, :] * w0 + embc[1:2, :] * (1.0 - w0)      # [1, H]
    lbt = _blk(bp_ref, offs_b['lb'])             # [2, E] task-conditional bias
    lbias = lbt[0:1, :] * w0 + lbt[1:2, :] * (1.0 - w0)          # [1, E]

    # ---- 5. decision network + temperature softmax -------------------------
    combined = jnp.concatenate([conv_f, st_f], axis=1)       # [B, 3*H2+2*H4]
    h1 = jnp.maximum(
        jnp.dot(combined.astype(jnp.bfloat16), _blk(wp_ref, offs_w['dw1r']),
                preferred_element_type=jnp.float32)
        + _blk(bp_ref, offs_b['db1']) + task_h1, 0.0)
    h2 = jnp.maximum(
        jnp.dot(h1.astype(jnp.bfloat16), _blk(wp_ref, offs_w['dw2']),
                preferred_element_type=jnp.float32)
        + _blk(bp_ref, offs_b['db2']), 0.0)
    logits = (jnp.dot(h2.astype(jnp.bfloat16), _blk(wp_ref, offs_w['dw3']),
                      preferred_element_type=jnp.float32)
              + _blk(bp_ref, offs_b['db3']) + lbias)

    logits = logits * (1.0 / TEMPERATURE)
    logits = logits - jnp.max(logits, axis=-1, keepdims=True)
    e = jnp.exp(logits)
    out_ref[...] = e * pl.reciprocal(jnp.sum(e, axis=-1, keepdims=True),
                                     approx=True)


def pack_params(params, input_size, hidden_size, num_experts=2):
    """Fold/fuse all module weights into two packed buffers.

    Call ONCE at init / parameter-update time, NOT inside the forward path.
    Returns (wpack [bf16 matmul weights], bpack [f32 biases + folded tables]).
    """
    F_, H = input_size, hidden_size
    H2, H4 = H // 2, H // 4
    offs_w, (wr, wcols), offs_b, (br, bcols) = _pack_layout(F_, H, num_experts)

    # folded multi-scale conv weight: window-position-major [KWIN*F, 3*H2]
    wc = jnp.zeros((KWIN, F_, 3 * H2), jnp.float32)
    for name, ksz, c0 in (('w_short', 3, 0), ('w_med', 7, H2),
                          ('w_long', 15, 2 * H2)):
        off = (KWIN - ksz) // 2        # centre the k-tap filter in the window
        wc = wc.at[off:off + ksz, :, c0:c0 + H2].set(params[name])
    wc = wc.reshape(KWIN * F_, 3 * H2)
    bc = jnp.concatenate([params['b_short'], params['b_med'],
                          params['b_long']], axis=1)

    # block-diagonal fusion of stats (4F->H2->H4) and trend (2F->H4->H4) MLPs
    w_st1 = jnp.zeros((6 * F_, H2 + H4), jnp.float32)
    w_st1 = w_st1.at[:4 * F_, :H2].set(params['sw1'])
    w_st1 = w_st1.at[4 * F_:, H2:].set(params['tw1'])
    b_st1 = jnp.concatenate([params['sb1'], params['tb1']], axis=1)
    w_st2 = jnp.zeros((H2 + H4, 2 * H4), jnp.float32)
    w_st2 = w_st2.at[:H2, :H4].set(params['sw2'])
    w_st2 = w_st2.at[H2:, H4:].set(params['tw2'])
    b_st2 = jnp.concatenate([params['sb2'], params['tb2']], axis=1)

    # fold task embedding through dw1: h1 += (emb @ dw1[task rows])[task]
    C = 3 * H2
    dw1 = params['dw1']                                       # [3H2+3H4, H]
    dw1r = jnp.concatenate([dw1[:C], dw1[C + H4:]], axis=0)   # [3H2+2H4, H]
    embc = jnp.dot(params['emb'], dw1[C:C + H4])              # [2, H]

    # task-conditional logit bias (torch: task 0 -> +0.1 on expert 1, else 0)
    lb = jnp.zeros((2, num_experts), jnp.float32)
    lb = lb.at[0, 1].set(0.1)
    lb = lb.at[1, 0].set(0.1)

    wblocks = {'wc': wc, 'w_st1': w_st1, 'w_st2': w_st2,
               'dw1r': dw1r, 'dw2': params['dw2'], 'dw3': params['dw3']}
    bblocks = {'bc': bc, 'b_st1': b_st1, 'b_st2': b_st2,
               'db1': params['db1'], 'db2': params['db2'], 'db3': params['db3'],
               'embc': embc, 'lb': lb}

    wpack = jnp.zeros((wr, wcols), jnp.bfloat16)
    for name, a in wblocks.items():
        r0, nr, nc = offs_w[name]
        wpack = wpack.at[r0:r0 + nr, :nc].set(a.astype(jnp.bfloat16))
    bpack = jnp.zeros((br, bcols), jnp.float32)
    for name, a in bblocks.items():
        r0, nr, nc = offs_b[name]
        bpack = bpack.at[r0:r0 + nr, :nc].set(a.astype(jnp.float32))
    return wpack, bpack


def make_gating_forward(input_size, hidden_size, num_experts=2):
    """Build the jitted forward(x, wpack, bpack, task_id) -> [B, E] gates."""
    H2, H4 = hidden_size // 2, hidden_size // 4
    offs_w, _, offs_b, _ = _pack_layout(input_size, hidden_size, num_experts)

    @jax.jit
    def forward(x, wpack, bpack, task_id):
        B, L, F_ = x.shape
        assert F_ == input_size
        x = x.astype(jnp.float32)
        task_arr = jnp.asarray(task_id, jnp.int32).reshape((1,))  # runtime id
        kernel = functools.partial(_gating_kernel, B, L, F_, H2, H4,
                                   num_experts, offs_w, offs_b)
        return pl.pallas_call(
            kernel,
            out_shape=jax.ShapeDtypeStruct((B, num_experts), jnp.float32),
            in_specs=[
                pl.BlockSpec(memory_space=pltpu.MemorySpace.SMEM),  # task id
                pl.BlockSpec(memory_space=pltpu.MemorySpace.VMEM),  # x [B,L,F]
                pl.BlockSpec(memory_space=pltpu.MemorySpace.VMEM),  # bf16 pack
                pl.BlockSpec(memory_space=pltpu.MemorySpace.VMEM),  # f32 pack
            ],
            out_specs=pl.BlockSpec(memory_space=pltpu.MemorySpace.VMEM),
        )(task_arr, x, wpack, bpack)

    return forward


def init_params(key, input_size=4, hidden_size=32, num_experts=2):
    """Deterministic synthetic parameters matching the module's shapes."""
    keys = jax.random.split(key, 11)
    h2, h4 = hidden_size // 2, hidden_size // 4

    def xavier(k, fan_in, fan_out):
        limit = (6.0 / (fan_in + fan_out)) ** 0.5
        return jax.random.uniform(k, (fan_in, fan_out), jnp.float32,
                                  -limit, limit)

    def kaiming_conv(k, c_out, c_in, ksz):
        # kaiming_normal_(mode='fan_out', relu): std = sqrt(2 / (c_out*ksz))
        std = (2.0 / (c_out * ksz)) ** 0.5
        # stored tap-major as [K, C_in, C_out]
        return jax.random.normal(k, (ksz, c_in, c_out), jnp.float32) * std

    total = h2 * 3 + h4 * 3
    return {
        'w_short': kaiming_conv(keys[0], h2, input_size, 3),
        'b_short': jnp.zeros((1, h2), jnp.float32),
        'w_med': kaiming_conv(keys[1], h2, input_size, 7),
        'b_med': jnp.zeros((1, h2), jnp.float32),
        'w_long': kaiming_conv(keys[2], h2, input_size, 15),
        'b_long': jnp.zeros((1, h2), jnp.float32),
        'emb': jax.random.normal(keys[3], (2, h4), jnp.float32),
        'sw1': xavier(keys[4], input_size * 4, h2),
        'sb1': jnp.zeros((1, h2), jnp.float32),
        'sw2': xavier(keys[5], h2, h4),
        'sb2': jnp.zeros((1, h4), jnp.float32),
        'tw1': xavier(keys[6], input_size * 2, h4),
        'tb1': jnp.zeros((1, h4), jnp.float32),
        'tw2': xavier(keys[7], h4, h4),
        'tb2': jnp.zeros((1, h4), jnp.float32),
        'dw1': xavier(keys[8], total, hidden_size),
        'db1': jnp.zeros((1, hidden_size), jnp.float32),
        'dw2': xavier(keys[9], hidden_size, h2),
        'db2': jnp.zeros((1, h2), jnp.float32),
        'dw3': xavier(keys[10], h2, num_experts),
        'db3': jnp.zeros((1, num_experts), jnp.float32),
    }


def reference_forward(x, params, task_id):
    """Pure-JAX (f32) mirror of the PyTorch module forward, for validation."""
    B, L, F_ = x.shape
    H = params['dw1'].shape[1]
    H2, H4 = H // 2, H // 4

    def conv_branch(w, b, ksz):
        pad = (ksz - 1) // 2
        xp = jnp.pad(x, ((0, 0), (pad, pad), (0, 0)))
        y = jnp.zeros((B, L, H2), jnp.float32) + b
        for k in range(ksz):
            y = y + jnp.einsum('blf,fo->blo', xp[:, k:k + L, :], w[k])
        return jnp.mean(jax.nn.relu(y), axis=1)

    conv_f = jnp.concatenate(
        [conv_branch(params['w_short'], params['b_short'], 3),
         conv_branch(params['w_med'], params['b_med'], 7),
         conv_branch(params['w_long'], params['b_long'], 15)], axis=1)
    task_emb = jnp.broadcast_to(params['emb'][task_id][None, :], (B, H4))
    mean = jnp.mean(x, axis=1)
    std = jnp.std(x, axis=1, ddof=1)
    stat_in = jnp.concatenate([mean, std, jnp.min(x, axis=1),
                               jnp.max(x, axis=1)], axis=1)
    stat_f = jax.nn.relu(
        jax.nn.relu(stat_in @ params['sw1'] + params['sb1'])
        @ params['sw2'] + params['sb2'])
    if L >= 7:
        slope = (x[:, -1] - x[:, -7]) / 7.0
        accel = ((x[:, -1] - 2.0 * x[:, -7] + x[:, -14]) / 49.0
                 if L >= 14 else jnp.zeros_like(slope))
    else:
        slope = jnp.zeros_like(mean)
        accel = jnp.zeros_like(mean)
    trend_in = jnp.concatenate([slope, accel], axis=1)
    trend_f = jax.nn.relu(
        jax.nn.relu(trend_in @ params['tw1'] + params['tb1'])
        @ params['tw2'] + params['tb2'])
    comb = jnp.concatenate([conv_f, task_emb, stat_f, trend_f], axis=1)
    h1 = jax.nn.relu(comb @ params['dw1'] + params['db1'])
    h2 = jax.nn.relu(h1 @ params['dw2'] + params['db2'])
    logits = h2 @ params['dw3'] + params['db3']
    if task_id == 0:
        logits = logits.at[:, 1].add(0.1)
    else:
        logits = logits.at[:, 0].add(0.1)
    return jax.nn.softmax(logits / TEMPERATURE, axis=-1)


if __name__ == "__main__":
    key = jax.random.PRNGKey(0)
    kx, kp = jax.random.split(key)

    B, L, F = 2, 16, 4       # batch, seq_len, input_size
    HIDDEN = 32
    NUM_EXPERTS = 2

    x = jax.random.normal(kx, (B, L, F), jnp.float32)
    params = init_params(kp, input_size=F, hidden_size=HIDDEN,
                         num_experts=NUM_EXPERTS)

    # Parameters are packed ONCE, outside the jitted forward path.
    wpack, bpack = jax.block_until_ready(
        pack_params(params, F, HIDDEN, NUM_EXPERTS))

    forward = make_gating_forward(F, HIDDEN, NUM_EXPERTS)

    # Same compiled kernel serves both tasks (task_id is a runtime SMEM scalar).
    gw0 = forward(x, wpack, bpack, 0)
    gw1 = forward(x, wpack, bpack, 1)
    gw0, gw1 = jax.block_until_ready((gw0, gw1))

    ref0 = reference_forward(x, params, 0)
    ref1 = reference_forward(x, params, 1)

    for gw, ref in ((gw0, ref0), (gw1, ref1)):
        assert gw.shape == (B, NUM_EXPERTS)
        assert bool(jnp.all(jnp.isfinite(gw)))
        # rows of a softmax must sum to 1 (approx reciprocal -> loose atol)
        assert bool(jnp.allclose(jnp.sum(gw, axis=-1), 1.0, atol=3e-3))
        # bf16 MXU operands -> loose tolerance vs the f32 reference
        assert bool(jnp.allclose(gw, ref, atol=5e-2))
    # the task-conditional logit bias must change the gates between tasks
    assert not bool(jnp.allclose(gw0, gw1, atol=1e-4))

    print("KERNEL_OK")
</pallas_src>

<mosaic_0001>
module attributes {stable_mosaic.version = 11 : i64} {
  func.func @_gating_kernel(%arg0: memref<1xi32, #tpu.memory_space<smem>>, %arg1: memref<2x16x4xf32, #tpu.memory_space<vmem>>, %arg2: memref<240x48xbf16, #tpu.memory_space<vmem>>, %arg3: memref<64x48xf32, #tpu.memory_space<vmem>>, %arg4: memref<2x2xf32, #tpu.memory_space<vmem>>) attributes {dimension_semantics = [], scalar_prefetch = 0 : i64, scratch_operands = 0 : i64, tpu.core_type = #tpu.core_type<tc>} {
    %cst = arith.constant 0.000000e+00 : f32
    %0 = vector.broadcast %cst : f32 to vector<7x4xf32>
    %c0 = arith.constant 0 : index
    %c0_0 = arith.constant 0 : index
    %c0_1 = arith.constant 0 : index
    %1 = vector.load %arg1[%c0, %c0_0, %c0_1] : memref<2x16x4xf32, #tpu.memory_space<vmem>>, vector<1x16x4xf32>
    %2 = vector.shape_cast %1 : vector<1x16x4xf32> to vector<16x4xf32>
    %3 = tpu.concatenate %0, %2, %0 in 0 : vector<7x4xf32>, vector<16x4xf32>, vector<7x4xf32> -> vector<30x4xf32>
    %4 = vector.extract_strided_slice %3 {offsets = [0, 0], sizes = [16, 4], strides = [1, 1]} : vector<30x4xf32> to vector<16x4xf32>
    %5 = vector.extract_strided_slice %3 {offsets = [1, 0], sizes = [16, 4], strides = [1, 1]} : vector<30x4xf32> to vector<16x4xf32>
    %6 = vector.extract_strided_slice %3 {offsets = [2, 0], sizes = [16, 4], strides = [1, 1]} : vector<30x4xf32> to vector<16x4xf32>
    %7 = vector.extract_strided_slice %3 {offsets = [3, 0], sizes = [16, 4], strides = [1, 1]} : vector<30x4xf32> to vector<16x4xf32>
    %8 = vector.extract_strided_slice %3 {offsets = [4, 0], sizes = [16, 4], strides = [1, 1]} : vector<30x4xf32> to vector<16x4xf32>
    %9 = vector.extract_strided_slice %3 {offsets = [5, 0], sizes = [16, 4], strides = [1, 1]} : vector<30x4xf32> to vector<16x4xf32>
    %10 = vector.extract_strided_slice %3 {offsets = [6, 0], sizes = [16, 4], strides = [1, 1]} : vector<30x4xf32> to vector<16x4xf32>
    %11 = vector.extract_strided_slice %3 {offsets = [7, 0], sizes = [16, 4], strides = [1, 1]} : vector<30x4xf32> to vector<16x4xf32>
    %12 = vector.extract_strided_slice %3 {offsets = [8, 0], sizes = [16, 4], strides = [1, 1]} : vector<30x4xf32> to vector<16x4xf32>
    %13 = vector.extract_strided_slice %3 {offsets = [9, 0], sizes = [16, 4], strides = [1, 1]} : vector<30x4xf32> to vector<16x4xf32>
    %14 = vector.extract_strided_slice %3 {offsets = [10, 0], sizes = [16, 4], strides = [1, 1]} : vector<30x4xf32> to vector<16x4xf32>
    %15 = vector.extract_strided_slice %3 {offsets = [11, 0], sizes = [16, 4], strides = [1, 1]} : vector<30x4xf32> to vector<16x4xf32>
    %16 = vector.extract_strided_slice %3 {offsets = [12, 0], sizes = [16, 4], strides = [1, 1]} : vector<30x4xf32> to vector<16x4xf32>
    %17 = vector.extract_strided_slice %3 {offsets = [13, 0], sizes = [16, 4], strides = [1, 1]} : vector<30x4xf32> to vector<16x4xf32>
    %18 = vector.extract_strided_slice %3 {offsets = [14, 0], sizes = [16, 4], strides = [1, 1]} : vector<30x4xf32> to vector<16x4xf32>
    %19 = tpu.concatenate %4, %5, %6, %7, %8, %9, %10, %11, %12, %13, %14, %15, %16, %17, %18 in 1 : vector<16x4xf32>, vector<16x4xf32>, vector<16x4xf32>, vector<16x4xf32>, vector<16x4xf32>, vector<16x4xf32>, vector<16x4xf32>, vector<16x4xf32>, vector<16x4xf32>, vector<16x4xf32>, vector<16x4xf32>, vector<16x4xf32>, vector<16x4xf32>, vector<16x4xf32>, vector<16x4xf32> -> vector<16x60xf32>
    %cst_2 = arith.constant dense<0.000000e+00> : vector<4xf32>
    %20 = vector.multi_reduction <add>, %2, %cst_2 [0] : vector<16x4xf32> to vector<4xf32>
    %21 = vector.shape_cast %20 : vector<4xf32> to vector<1x4xf32>
    %cst_3 = arith.constant 6.250000e-02 : f32
    %22 = vector.broadcast %cst_3 : f32 to vector<1x4xf32>
    %23 = arith.mulf %21, %22 : vector<1x4xf32>
    %24 = vector.broadcast %23 : vector<1x4xf32> to vector<16x4xf32>
    %25 = arith.subf %2, %24 : vector<16x4xf32>
    %26 = arith.mulf %25, %25 : vector<16x4xf32>
    %cst_4 = arith.constant dense<0.000000e+00> : vector<4xf32>
    %27 = vector.multi_reduction <add>, %26, %cst_4 [0] : vector<16x4xf32> to vector<4xf32>
    %28 = vector.shape_cast %27 : vector<4xf32> to vector<1x4xf32>
    %cst_5 = arith.constant 0.0666666701 : f32
    %29 = vector.broadcast %cst_5 : f32 to vector<1x4xf32>
    %30 = arith.mulf %28, %29 : vector<1x4xf32>
    %31 = math.sqrt %30 : vector<1x4xf32>
    %cst_6 = arith.constant dense<0x7F800000> : vector<4xf32>
    %32 = vector.multi_reduction <minimumf>, %2, %cst_6 [0] : vector<16x4xf32> to vector<4xf32>
    %33 = vector.shape_cast %32 : vector<4xf32> to vector<1x4xf32>
    %cst_7 = arith.constant dense<0xFF800000> : vector<4xf32>
    %34 = vector.multi_reduction <maximumf>, %2, %cst_7 [0] : vector<16x4xf32> to vector<4xf32>
    %35 = vector.shape_cast %34 : vector<4xf32> to vector<1x4xf32>
    %36 = vector.extract_strided_slice %2 {offsets = [15, 0], sizes = [1, 4], strides = [1, 1]} : vector<16x4xf32> to vector<1x4xf32>
    %37 = vector.extract_strided_slice %2 {offsets = [9, 0], sizes = [1, 4], strides = [1, 1]} : vector<16x4xf32> to vector<1x4xf32>
    %38 = arith.subf %36, %37 : vector<1x4xf32>
    %cst_8 = arith.constant 0.142857149 : f32
    %39 = vector.broadcast %cst_8 : f32 to vector<1x4xf32>
    %40 = arith.mulf %38, %39 : vector<1x4xf32>
    %41 = vector.extract_strided_slice %2 {offsets = [15, 0], sizes = [1, 4], strides = [1, 1]} : vector<16x4xf32> to vector<1x4xf32>
    %42 = vector.extract_strided_slice %2 {offsets = [9, 0], sizes = [1, 4], strides = [1, 1]} : vector<16x4xf32> to vector<1x4xf32>
    %cst_9 = arith.constant 2.000000e+00 : f32
    %43 = vector.broadcast %cst_9 : f32 to vector<1x4xf32>
    %44 = arith.mulf %43, %42 : vector<1x4xf32>
    %45 = arith.subf %41, %44 : vector<1x4xf32>
    %46 = vector.extract_strided_slice %2 {offsets = [2, 0], sizes = [1, 4], strides = [1, 1]} : vector<16x4xf32> to vector<1x4xf32>
    %47 = arith.addf %45, %46 : vector<1x4xf32>
    %cst_10 = arith.constant 0.0204081628 : f32
    %48 = vector.broadcast %cst_10 : f32 to vector<1x4xf32>
    %49 = arith.mulf %47, %48 : vector<1x4xf32>
    %50 = tpu.concatenate %23, %31, %33, %35, %40, %49 in 1 : vector<1x4xf32>, vector<1x4xf32>, vector<1x4xf32>, vector<1x4xf32>, vector<1x4xf32>, vector<1x4xf32> -> vector<1x24xf32>
    %c1 = arith.constant 1 : index
    %c0_11 = arith.constant 0 : index
    %c0_12 = arith.constant 0 : index
    %51 = vector.load %arg1[%c1, %c0_11, %c0_12] : memref<2x16x4xf32, #tpu.memory_space<vmem>>, vector<1x16x4xf32>
    %52 = vector.shape_cast %51 : vector<1x16x4xf32> to vector<16x4xf32>
    %53 = tpu.concatenate %0, %52, %0 in 0 : vector<7x4xf32>, vector<16x4xf32>, vector<7x4xf32> -> vector<30x4xf32>
    %54 = vector.extract_strided_slice %53 {offsets = [0, 0], sizes = [16, 4], strides = [1, 1]} : vector<30x4xf32> to vector<16x4xf32>
    %55 = vector.extract_strided_slice %53 {offsets = [1, 0], sizes = [16, 4], strides = [1, 1]} : vector<30x4xf32> to vector<16x4xf32>
    %56 = vector.extract_strided_slice %53 {offsets = [2, 0], sizes = [16, 4], strides = [1, 1]} : vector<30x4xf32> to vector<16x4xf32>
    %57 = vector.extract_strided_slice %53 {offsets = [3, 0], sizes = [16, 4], strides = [1, 1]} : vector<30x4xf32> to vector<16x4xf32>
    %58 = vector.extract_strided_slice %53 {offsets = [4, 0], sizes = [16, 4], strides = [1, 1]} : vector<30x4xf32> to vector<16x4xf32>
    %59 = vector.extract_strided_slice %53 {offsets = [5, 0], sizes = [16, 4], strides = [1, 1]} : vector<30x4xf32> to vector<16x4xf32>
    %60 = vector.extract_strided_slice %53 {offsets = [6, 0], sizes = [16, 4], strides = [1, 1]} : vector<30x4xf32> to vector<16x4xf32>
    %61 = vector.extract_strided_slice %53 {offsets = [7, 0], sizes = [16, 4], strides = [1, 1]} : vector<30x4xf32> to vector<16x4xf32>
    %62 = vector.extract_strided_slice %53 {offsets = [8, 0], sizes = [16, 4], strides = [1, 1]} : vector<30x4xf32> to vector<16x4xf32>
    %63 = vector.extract_strided_slice %53 {offsets = [9, 0], sizes = [16, 4], strides = [1, 1]} : vector<30x4xf32> to vector<16x4xf32>
    %64 = vector.extract_strided_slice %53 {offsets = [10, 0], sizes = [16, 4], strides = [1, 1]} : vector<30x4xf32> to vector<16x4xf32>
    %65 = vector.extract_strided_slice %53 {offsets = [11, 0], sizes = [16, 4], strides = [1, 1]} : vector<30x4xf32> to vector<16x4xf32>
    %66 = vector.extract_strided_slice %53 {offsets = [12, 0], sizes = [16, 4], strides = [1, 1]} : vector<30x4xf32> to vector<16x4xf32>
    %67 = vector.extract_strided_slice %53 {offsets = [13, 0], sizes = [16, 4], strides = [1, 1]} : vector<30x4xf32> to vector<16x4xf32>
    %68 = vector.extract_strided_slice %53 {offsets = [14, 0], sizes = [16, 4], strides = [1, 1]} : vector<30x4xf32> to vector<16x4xf32>
    %69 = tpu.concatenate %54, %55, %56, %57, %58, %59, %60, %61, %62, %63, %64, %65, %66, %67, %68 in 1 : vector<16x4xf32>, vector<16x4xf32>, vector<16x4xf32>, vector<16x4xf32>, vector<16x4xf32>, vector<16x4xf32>, vector<16x4xf32>, vector<16x4xf32>, vector<16x4xf32>, vector<16x4xf32>, vector<16x4xf32>, vector<16x4xf32>, vector<16x4xf32>, vector<16x4xf32>, vector<16x4xf32> -> vector<16x60xf32>
    %cst_13 = arith.constant dense<0.000000e+00> : vector<4xf32>
    %70 = vector.multi_reduction <add>, %52, %cst_13 [0] : vector<16x4xf32> to vector<4xf32>
    %71 = vector.shape_cast %70 : vector<4xf32> to vector<1x4xf32>
    %cst_14 = arith.constant 6.250000e-02 : f32
    %72 = vector.broadcast %cst_14 : f32 to vector<1x4xf32>
    %73 = arith.mulf %71, %72 : vector<1x4xf32>
    %74 = vector.broadcast %73 : vector<1x4xf32> to vector<16x4xf32>
    %75 = arith.subf %52, %74 : vector<16x4xf32>
    %76 = arith.mulf %75, %75 : vector<16x4xf32>
    %cst_15 = arith.constant dense<0.000000e+00> : vector<4xf32>
    %77 = vector.multi_reduction <add>, %76, %cst_15 [0] : vector<16x4xf32> to vector<4xf32>
    %78 = vector.shape_cast %77 : vector<4xf32> to vector<1x4xf32>
    %cst_16 = arith.constant 0.0666666701 : f32
    %79 = vector.broadcast %cst_16 : f32 to vector<1x4xf32>
    %80 = arith.mulf %78, %79 : vector<1x4xf32>
    %81 = math.sqrt %80 : vector<1x4xf32>
    %cst_17 = arith.constant dense<0x7F800000> : vector<4xf32>
    %82 = vector.multi_reduction <minimumf>, %52, %cst_17 [0] : vector<16x4xf32> to vector<4xf32>
    %83 = vector.shape_cast %82 : vector<4xf32> to vector<1x4xf32>
    %cst_18 = arith.constant dense<0xFF800000> : vector<4xf32>
    %84 = vector.multi_reduction <maximumf>, %52, %cst_18 [0] : vector<16x4xf32> to vector<4xf32>
    %85 = vector.shape_cast %84 : vector<4xf32> to vector<1x4xf32>
    %86 = vector.extract_strided_slice %52 {offsets = [15, 0], sizes = [1, 4], strides = [1, 1]} : vector<16x4xf32> to vector<1x4xf32>
    %87 = vector.extract_strided_slice %52 {offsets = [9, 0], sizes = [1, 4], strides = [1, 1]} : vector<16x4xf32> to vector<1x4xf32>
    %88 = arith.subf %86, %87 : vector<1x4xf32>
    %cst_19 = arith.constant 0.142857149 : f32
    %89 = vector.broadcast %cst_19 : f32 to vector<1x4xf32>
    %90 = arith.mulf %88, %89 : vector<1x4xf32>
    %91 = vector.extract_strided_slice %52 {offsets = [15, 0], sizes = [1, 4], strides = [1, 1]} : vector<16x4xf32> to vector<1x4xf32>
    %92 = vector.extract_strided_slice %52 {offsets = [9, 0], sizes = [1, 4], strides = [1, 1]} : vector<16x4xf32> to vector<1x4xf32>
    %cst_20 = arith.constant 2.000000e+00 : f32
    %93 = vector.broadcast %cst_20 : f32 to vector<1x4xf32>
    %94 = arith.mulf %93, %92 : vector<1x4xf32>
    %95 = arith.subf %91, %94 : vector<1x4xf32>
    %96 = vector.extract_strided_slice %52 {offsets = [2, 0], sizes = [1, 4], strides = [1, 1]} : vector<16x4xf32> to vector<1x4xf32>
    %97 = arith.addf %95, %96 : vector<1x4xf32>
    %cst_21 = arith.constant 0.0204081628 : f32
    %98 = vector.broadcast %cst_21 : f32 to vector<1x4xf32>
    %99 = arith.mulf %97, %98 : vector<1x4xf32>
    %100 = tpu.concatenate %73, %81, %83, %85, %90, %99 in 1 : vector<1x4xf32>, vector<1x4xf32>, vector<1x4xf32>, vector<1x4xf32>, vector<1x4xf32>, vector<1x4xf32> -> vector<1x24xf32>
    %101 = tpu.concatenate %19, %69 in 0 : vector<16x60xf32>, vector<16x60xf32> -> vector<32x60xf32>
    %102 = tpu.concatenate %50, %100 in 0 : vector<1x24xf32>, vector<1x24xf32> -> vector<2x24xf32>
    %103 = arith.truncf %101 : vector<32x60xf32> to vector<32x60xbf16>
    %c0_22 = arith.constant 0 : index
    %c0_23 = arith.constant 0 : index
    %104 = vector.load %arg2[%c0_22, %c0_23] : memref<240x48xbf16, #tpu.memory_space<vmem>>, vector<60x48xbf16>
    %cst_24 = arith.constant dense<0.000000e+00> : vector<32x48xf32>
    %105 = tpu.matmul %103, %104, %cst_24 {dimension_numbers = #tpu.dot_dimension_numbers<[1], [0], [0], [1], [0, 0, 1, 1], [], []>} : vector<32x60xbf16>, vector<60x48xbf16>, vector<32x48xf32> -> vector<32x48xf32>
    %c0_25 = arith.constant 0 : index
    %c0_26 = arith.constant 0 : index
    %106 = vector.load %arg3[%c0_25, %c0_26] : memref<64x48xf32, #tpu.memory_space<vmem>>, vector<1x48xf32>
    %107 = vector.broadcast %106 : vector<1x48xf32> to vector<32x48xf32>
    %108 = arith.addf %105, %107 : vector<32x48xf32>
    %cst_27 = arith.constant 0.000000e+00 : f32
    %109 = vector.broadcast %cst_27 : f32 to vector<32x48xf32>
    %110 = arith.maximumf %108, %109 : vector<32x48xf32>
    %111 = vector.extract_strided_slice %110 {offsets = [0, 0], sizes = [16, 48], strides = [1, 1]} : vector<32x48xf32> to vector<16x48xf32>
    %cst_28 = arith.constant dense<0.000000e+00> : vector<48xf32>
    %112 = vector.multi_reduction <add>, %111, %cst_28 [0] : vector<16x48xf32> to vector<48xf32>
    %113 = vector.shape_cast %112 : vector<48xf32> to vector<1x48xf32>
    %cst_29 = arith.constant 6.250000e-02 : f32
    %114 = vector.broadcast %cst_29 : f32 to vector<1x48xf32>
    %115 = arith.mulf %113, %114 : vector<1x48xf32>
    %116 = vector.extract_strided_slice %110 {offsets = [16, 0], sizes = [16, 48], strides = [1, 1]} : vector<32x48xf32> to vector<16x48xf32>
    %cst_30 = arith.constant dense<0.000000e+00> : vector<48xf32>
    %117 = vector.multi_reduction <add>, %116, %cst_30 [0] : vector<16x48xf32> to vector<48xf32>
    %118 = vector.shape_cast %117 : vector<48xf32> to vector<1x48xf32>
    %cst_31 = arith.constant 6.250000e-02 : f32
    %119 = vector.broadcast %cst_31 : f32 to vector<1x48xf32>
    %120 = arith.mulf %118, %119 : vector<1x48xf32>
    %121 = tpu.concatenate %115, %120 in 0 : vector<1x48xf32>, vector<1x48xf32> -> vector<2x48xf32>
    %122 = arith.truncf %102 : vector<2x24xf32> to vector<2x24xbf16>
    %c64 = arith.constant 64 : index
    %c0_32 = arith.constant 0 : index
    %123 = vector.load %arg2[%c64, %c0_32] : memref<240x48xbf16, #tpu.memory_space<vmem>>, vector<24x24xbf16>
    %cst_33 = arith.constant dense<0.000000e+00> : vector<2x24xf32>
    %124 = tpu.matmul %122, %123, %cst_33 {dimension_numbers = #tpu.dot_dimension_numbers<[1], [0], [0], [1], [0, 0, 1, 1], [], []>} : vector<2x24xbf16>, vector<24x24xbf16>, vector<2x24xf32> -> vector<2x24xf32>
    %c8 = arith.constant 8 : index
    %c0_34 = arith.constant 0 : index
    %125 = vector.load %arg3[%c8, %c0_34] : memref<64x48xf32, #tpu.memory_space<vmem>>, vector<1x24xf32>
    %126 = vector.broadcast %125 : vector<1x24xf32> to vector<2x24xf32>
    %127 = arith.addf %124, %126 : vector<2x24xf32>
    %cst_35 = arith.constant 0.000000e+00 : f32
    %128 = vector.broadcast %cst_35 : f32 to vector<2x24xf32>
    %129 = arith.maximumf %127, %128 : vector<2x24xf32>
    %130 = arith.truncf %129 : vector<2x24xf32> to vector<2x24xbf16>
    %c96 = arith.constant 96 : index
    %c0_36 = arith.constant 0 : index
    %131 = vector.load %arg2[%c96, %c0_36] : memref<240x48xbf16, #tpu.memory_space<vmem>>, vector<24x16xbf16>
    %cst_37 = arith.constant dense<0.000000e+00> : vector<2x16xf32>
    %132 = tpu.matmul %130, %131, %cst_37 {dimension_numbers = #tpu.dot_dimension_numbers<[1], [0], [0], [1], [0, 0, 1, 1], [], []>} : vector<2x24xbf16>, vector<24x16xbf16>, vector<2x16xf32> -> vector<2x16xf32>
    %c16 = arith.constant 16 : index
    %c0_38 = arith.constant 0 : index
    %133 = vector.load %arg3[%c16, %c0_38] : memref<64x48xf32, #tpu.memory_space<vmem>>, vector<1x16xf32>
    %134 = vector.broadcast %133 : vector<1x16xf32> to vector<2x16xf32>
    %135 = arith.addf %132, %134 : vector<2x16xf32>
    %cst_39 = arith.constant 0.000000e+00 : f32
    %136 = vector.broadcast %cst_39 : f32 to vector<2x16xf32>
    %137 = arith.maximumf %135, %136 : vector<2x16xf32>
    %c0_40 = arith.constant 0 : index
    %138 = memref.load %arg0[%c0_40] : memref<1xi32, #tpu.memory_space<smem>>
    %c0_i32 = arith.constant 0 : i32
    %139 = arith.cmpi eq, %138, %c0_i32 : i32
    %140 = arith.extui %139 : i1 to i32
    %141 = arith.sitofp %140 : i32 to f32
    %c48 = arith.constant 48 : index
    %c0_41 = arith.constant 0 : index
    %142 = vector.load %arg3[%c48, %c0_41] : memref<64x48xf32, #tpu.memory_space<vmem>>, vector<2x32xf32>
    %143 = vector.extract_strided_slice %142 {offsets = [0, 0], sizes = [1, 32], strides = [1, 1]} : vector<2x32xf32> to vector<1x32xf32>
    %144 = vector.broadcast %141 : f32 to vector<1x32xf32>
    %145 = arith.mulf %143, %144 : vector<1x32xf32>
    %146 = vector.extract_strided_slice %142 {offsets = [1, 0], sizes = [1, 32], strides = [1, 1]} : vector<2x32xf32> to vector<1x32xf32>
    %cst_42 = arith.constant 1.000000e+00 : f32
    %147 = arith.subf %cst_42, %141 : f32
    %148 = vector.broadcast %147 : f32 to vector<1x32xf32>
    %149 = arith.mulf %146, %148 : vector<1x32xf32>
    %150 = arith.addf %145, %149 : vector<1x32xf32>
    %c56 = arith.constant 56 : index
    %c0_43 = arith.constant 0 : index
    %151 = vector.load %arg3[%c56, %c0_43] : memref<64x48xf32, #tpu.memory_space<vmem>>, vector<2x2xf32>
    %152 = vector.extract_strided_slice %151 {offsets = [0, 0], sizes = [1, 2], strides = [1, 1]} : vector<2x2xf32> to vector<1x2xf32>
    %153 = vector.broadcast %141 : f32 to vector<1x2xf32>
    %154 = arith.mulf %152, %153 : vector<1x2xf32>
    %155 = vector.extract_strided_slice %151 {offsets = [1, 0], sizes = [1, 2], strides = [1, 1]} : vector<2x2xf32> to vector<1x2xf32>
    %cst_44 = arith.constant 1.000000e+00 : f32
    %156 = arith.subf %cst_44, %141 : f32
    %157 = vector.broadcast %156 : f32 to vector<1x2xf32>
    %158 = arith.mulf %155, %157 : vector<1x2xf32>
    %159 = arith.addf %154, %158 : vector<1x2xf32>
    %160 = tpu.concatenate %121, %137 in 1 : vector<2x48xf32>, vector<2x16xf32> -> vector<2x64xf32>
    %161 = arith.truncf %160 : vector<2x64xf32> to vector<2x64xbf16>
    %c128 = arith.constant 128 : index
    %c0_45 = arith.constant 0 : index
    %162 = vector.load %arg2[%c128, %c0_45] : memref<240x48xbf16, #tpu.memory_space<vmem>>, vector<64x32xbf16>
    %cst_46 = arith.constant dense<0.000000e+00> : vector<2x32xf32>
    %163 = tpu.matmul %161, %162, %cst_46 {dimension_numbers = #tpu.dot_dimension_numbers<[1], [0], [0], [1], [0, 0, 1, 1], [], []>} : vector<2x64xbf16>, vector<64x32xbf16>, vector<2x32xf32> -> vector<2x32xf32>
    %c24 = arith.constant 24 : index
    %c0_47 = arith.constant 0 : index
    %164 = vector.load %arg3[%c24, %c0_47] : memref<64x48xf32, #tpu.memory_space<vmem>>, vector<1x32xf32>
    %165 = vector.broadcast %164 : vector<1x32xf32> to vector<2x32xf32>
    %166 = arith.addf %163, %165 : vector<2x32xf32>
    %167 = vector.broadcast %150 : vector<1x32xf32> to vector<2x32xf32>
    %168 = arith.addf %166, %167 : vector<2x32xf32>
    %cst_48 = arith.constant 0.000000e+00 : f32
    %169 = vector.broadcast %cst_48 : f32 to vector<2x32xf32>
    %170 = arith.maximumf %168, %169 : vector<2x32xf32>
    %171 = arith.truncf %170 : vector<2x32xf32> to vector<2x32xbf16>
    %c192 = arith.constant 192 : index
    %c0_49 = arith.constant 0 : index
    %172 = vector.load %arg2[%c192, %c0_49] : memref<240x48xbf16, #tpu.memory_space<vmem>>, vector<32x16xbf16>
    %cst_50 = arith.constant dense<0.000000e+00> : vector<2x16xf32>
    %173 = tpu.matmul %171, %172, %cst_50 {dimension_numbers = #tpu.dot_dimension_numbers<[1], [0], [0], [1], [0, 0, 1, 1], [], []>} : vector<2x32xbf16>, vector<32x16xbf16>, vector<2x16xf32> -> vector<2x16xf32>
    %c32 = arith.constant 32 : index
    %c0_51 = arith.constant 0 : index
    %174 = vector.load %arg3[%c32, %c0_51] : memref<64x48xf32, #tpu.memory_space<vmem>>, vector<1x16xf32>
    %175 = vector.broadcast %174 : vector<1x16xf32> to vector<2x16xf32>
    %176 = arith.addf %173, %175 : vector<2x16xf32>
    %cst_52 = arith.constant 0.000000e+00 : f32
    %177 = vector.broadcast %cst_52 : f32 to vector<2x16xf32>
    %178 = arith.maximumf %176, %177 : vector<2x16xf32>
    %179 = arith.truncf %178 : vector<2x16xf32> to vector<2x16xbf16>
    %c224 = arith.constant 224 : index
    %c0_53 = arith.constant 0 : index
    %180 = vector.load %arg2[%c224, %c0_53] : memref<240x48xbf16, #tpu.memory_space<vmem>>, vector<16x2xbf16>
    %cst_54 = arith.constant dense<0.000000e+00> : vector<2x2xf32>
    %181 = tpu.matmul %179, %180, %cst_54 {dimension_numbers = #tpu.dot_dimension_numbers<[1], [0], [0], [1], [0, 0, 1, 1], [], []>} : vector<2x16xbf16>, vector<16x2xbf16>, vector<2x2xf32> -> vector<2x2xf32>
    %c40 = arith.constant 40 : index
    %c0_55 = arith.constant 0 : index
    %182 = vector.load %arg3[%c40, %c0_55] : memref<64x48xf32, #tpu.memory_space<vmem>>, vector<1x2xf32>
    %183 = vector.broadcast %182 : vector<1x2xf32> to vector<2x2xf32>
    %184 = arith.addf %181, %183 : vector<2x2xf32>
    %185 = vector.broadcast %159 : vector<1x2xf32> to vector<2x2xf32>
    %186 = arith.addf %184, %185 : vector<2x2xf32>
    %cst_56 = arith.constant 5.000000e-01 : f32
    %187 = vector.broadcast %cst_56 : f32 to vector<2x2xf32>
    %188 = arith.mulf %186, %187 : vector<2x2xf32>
    %cst_57 = arith.constant dense<0xFF800000> : vector<2xf32>
    %189 = vector.multi_reduction <maximumf>, %188, %cst_57 [1] : vector<2x2xf32> to vector<2xf32>
    %190 = vector.shape_cast %189 : vector<2xf32> to vector<2x1xf32>
    %191 = vector.broadcast %190 : vector<2x1xf32> to vector<2x2xf32>
    %192 = arith.subf %188, %191 : vector<2x2xf32>
    %193 = math.exp %192 : vector<2x2xf32>
    %cst_58 = arith.constant dense<0.000000e+00> : vector<2xf32>
    %194 = vector.multi_reduction <add>, %193, %cst_58 [1] : vector<2x2xf32> to vector<2xf32>
    %195 = vector.shape_cast %194 : vector<2xf32> to vector<2x1xf32>
    %196 = tpu.reciprocal %195 {approx = true} : vector<2x1xf32> -> vector<2x1xf32>
    %197 = vector.broadcast %196 : vector<2x1xf32> to vector<2x2xf32>
    %198 = arith.mulf %193, %197 : vector<2x2xf32>
    %c0_59 = arith.constant 0 : index
    %c0_60 = arith.constant 0 : index
    %199 = vector.load %arg4[%c0_59, %c0_60] : memref<2x2xf32, #tpu.memory_space<vmem>>, vector<2x2xf32>
    tpu.vector_store %arg4[%c0_59, %c0_60], %198 {strides = array<i32>} : memref<2x2xf32, #tpu.memory_space<vmem>>, vector<2x2xf32>,
    return
  }
}

</mosaic_0001>

<bundles_post_ra>
// kernel: forward.1
= control target key start
LH: loop header
LB: loop body
LE: loop exit
PB: predicated region body
PF: predicated region fallthrough
CT: control target
= control target key end

     0   :  { %vm173_vm0 = vcmask 31744   ;;  %s1753_s0 = inlined_call_operand.<no memory space> [shape: s32[1], index: 0, kind: input, shape index: {}]   ;;  %s1754_s1 = inlined_call_operand.vmem [shape: f32[2,16,4], index: 1, kind: input, shape index: {}]   ;;  %s1755_s2 = inlined_call_operand.vmem [shape: bf16[240,48], index: 2, kind: input, shape index: {}]   ;;  %s1756_s3 = inlined_call_operand.vmem [shape: f32[64,48], index: 3, kind: input, shape index: {}]   ;;  %s1757_s4 = inlined_call_operand.hbm [shape: f32[2,2], index: 4, kind: output, shape index: {}]  }
   0x1   :  { %v1249_v0 = vld [vmem:[%s1754_s1] sm:$0xff]  ;;  %v1254_v1 = vld [vmem:[%s1754_s1 + $0x8] sm:$0xff]  ;;  %v1259_v2 = vld [vmem:[%s1754_s1 + $0x10] sm:$0xff] }
   0x2   :  { %v215_v3 = vsel %vm173_vm0, %v1249_v0, 0.0  ;;  %v216_v4 = vsel %vm173_vm0, %v1254_v1, 0.0  ;;  %v1268_v5 = vld [vmem:[%s1754_s1 + $0x18] sm:$0xff]  ;;  %v477_v6 = vsel %vm173_vm0, %v1259_v2, 0.0 }
   0x3   :  { %v217_v7 = vadd.f32 %v216_v4, %v215_v3  ;;  %v478_v8 = vsel %vm173_vm0, %v1268_v5, 0.0 }
   0x4   :  { %v479_v9 = vadd.f32 %v478_v8, %v477_v6 }
   0x5   :  { %v218_v10 = vrot.slane %v217_v7, 4 }
   0x6   :  { %v480_v11 = vrot.slane %v479_v9, 4 }
   0x7   :  { %10 = vsyncpa [#allocation4], 0  ;;  %v219_v12 = vadd.f32 %v218_v10, %v217_v7  ;;  %v260_v23 = vsel %vm173_vm0, %v1249_v0, -inf  ;;  %v261_v24 = vsel %vm173_vm0, %v1254_v1, -inf  ;;  %v522_v25 = vsel %vm173_vm0, %v1259_v2, -inf  ;;  %s1205_s1 = smov 12  }
   0x8   :  { %v481_v13 = vadd.f32 %v480_v11, %v479_v9  ;;  %v262_v27 = vmax.f32 %v260_v23, %v261_v24  ;;  %v523_v28 = vsel %vm173_vm0, %v1268_v5, -inf  ;;  %v269_v63 = vrot.slane %v1254_v1, 2  ;;  %s1206_s23 = smov 16   ;;  %s1207_s24 = smov 20  }
   0x9   :  { %v220_v14 = vrot.slane %v219_v12, 2  ;;  %v524_v31 = vmax.f32 %v522_v25, %v523_v28  ;;  %v531_v3 = vrot.slane %v1268_v5, 2  ;;  %v251_v7 = vsel %vm173_vm0, %v1249_v0, inf  ;;  %s1208_s25 = smov 4   ;;  %s1209_s26 = smov 24  }
   0xa   :  { %v482_v15 = vrot.slane %v481_v13, 2  ;;  %v263_v34 = vrot.slane %v262_v27, 4  ;;  %v252_v9 = vsel %vm173_vm0, %v1254_v1, inf  ;;  %v271_v10 = vsub.f32 %v1254_v1, %v269_v63  ;;  %s1210_s27 = smov 8   ;;  %s1212_s28 = smov 32  }
   0xb   :  { %v221_v16 = vadd.f32 %v220_v14, %v219_v12  ;;  %v525_v37 = vrot.slane %v524_v31, 4  ;;  %v533_v11 = vsub.f32 %v1268_v5, %v531_v3  ;;  %v514_v14 = vsel %vm173_vm0, %v1268_v5, inf  ;;  %s1213_s29 = smov 36   ;;  %s1214_s6 = smov 44  }
   0xc   :  { %v483_v17 = vadd.f32 %v482_v15, %v481_v13  ;;  %v264_v40 = vmax.f32 %v262_v27, %v263_v34  ;;  %v513_v13 = vsel %vm173_vm0, %v1259_v2, inf  ;;  %vm24_vm1 = vcmask 1046528   ;;  %s1215_s7 = smov 48   ;;  %s1216_s10 = smov 56  }
   0xd   :  { %v222_v18 = vrot.slane %v221_v16, 1  ;;  %v526_v43 = vmax.f32 %v524_v31, %v525_v37  ;;  %v535_v31 = vmul.f32 2.0, %v1268_v5  ;;  %v278_v34 = vrot.slane %v1249_v0, 3  ;;  %s1217_s11 = smov 28   ;;  %s1218_s12 = smov 40  }
   0xe   :  { %v484_v19 = vrot.slane %v483_v17, 1  ;;  %v265_v47 = vrot.slane %v264_v40, 2  ;;  %vm58_vm2 = vcmask 1044480   ;;  %vm94_vm6 = vcmask 1041408   ;;  %s1219_s13 = smov 52   ;;  %p735_p0 = scmp.eq.s32.totalorder %s1753_s0, 0 }
   0xf   :  { %v223_v20 = vadd.f32 %v222_v18, %v221_v16  ;;  %v527_v49 = vrot.slane %v526_v43, 2  ;;  %v272_v16 = vmul.f32 0.14285715, %v271_v10  ;;  %v537_v37 = vrot.slane %v535_v31, 2 }
  0x10   :  { %v485_v21 = vadd.f32 %v484_v19, %v483_v17  ;;  %v266_v51 = vmax.f32 %v264_v40, %v265_v47  ;;  %v534_v17 = vmul.f32 0.14285715, %v533_v11  ;;  %v253_v19 = vmin.f32 %v251_v7, %v252_v9  ;;  %s736_s19 = scalar_select %p735_p0, 1, 0 }
  0x11   :  { %v1274_v22 = vmul.f32 0.0625, %v223_v20  ;;  %v528_v53 = vmax.f32 %v526_v43, %v527_v49  ;;  %v295_v23 = vrot.slane %v272_v16, 7  ;;  %vm46_vm8 = vcmask 1045504  }
  0x12   :  { %v1282_v26 = vmul.f32 0.0625, %v485_v21  ;;  %v267_v55 = vrot.slane %v266_v51, 1  ;;  %v515_v21 = vmin.f32 %v513_v13, %v514_v14  ;;  %v557_v24 = vrot.slane %v534_v17, 7  ;;  %s737_s22 = scvt.s32.f32 %s736_s19 }
  0x13   :  { %v225_v29 = vsub.f32 %v1249_v0, %v1274_v22  ;;  %v226_v30 = vsub.f32 %v1254_v1, %v1274_v22  ;;  %v529_v57 = vrot.slane %v528_v53, 1  ;;  %v254_v27 = vrot.slane %v253_v19, 4 }
  0x14   :  { %v487_v32 = vsub.f32 %v1259_v2, %v1282_v26  ;;  %v488_v33 = vsub.f32 %v1268_v5, %v1282_v26  ;;  %v268_v59 = vmax.f32 %v266_v51, %v267_v55  ;;  %v516_v28 = vrot.slane %v515_v21, 4 }
  0x15   :  { %v227_v35 = vmul.f32 %v225_v29, %v225_v29  ;;  %v228_v36 = vmul.f32 %v226_v30, %v226_v30  ;;  %v530_v61 = vmax.f32 %v528_v53, %v529_v57  ;;  %v1015_v29 = vpack.i.bf16 %v295_v23, %v557_v24 }
  0x16   :  { %v489_v38 = vmul.f32 %v487_v32, %v487_v32  ;;  %v490_v39 = vmul.f32 %v488_v33, %v488_v33  ;;  %v273_v30 = vmul.f32 2.0, %v1254_v1  ;;  %v25_v32 = vrot.slane %v1249_v0, 1 }
  0x17   :  { %v229_v41 = vsel %vm173_vm0, %v227_v35, 0.0  ;;  %v230_v42 = vsel %vm173_vm0, %v228_v36, 0.0  ;;  %v1010_v6 = vpack.i.bf16 %v268_v59, %v530_v61  ;;  %v26_v35 = vrot.slane %v1254_v1, 1 }
  0x18   :  { %v231_v44 = vadd.f32 %v230_v42, %v229_v41  ;;  %v491_v45 = vsel %vm173_vm0, %v489_v38, 0.0  ;;  %v492_v46 = vsel %vm173_vm0, %v490_v39, 0.0  ;;  %v275_v33 = vrot.slane %v273_v30, 2 }
  0x19   :  { %v493_v48 = vadd.f32 %v492_v46, %v491_v45  ;;  %1011 = vrot.lane.b32.xlu1 %v1010_v6, %s1205_s1  ;;  %v255_v36 = vmin.f32 %v253_v19, %v254_v27  ;;  %v540_v38 = vrot.slane %v1259_v2, 3  ;;  %v1325_v39 = vsel %vm24_vm1, 0.0, %v25_v32 }
  0x1a   :  { %v232_v50 = vrot.slane %v231_v44, 4  ;;  %v517_v41 = vmin.f32 %v515_v21, %v516_v28  ;;  %v277_v42 = vsub.f32 %v1254_v1, %v275_v33  ;;  %v539_v45 = vsub.f32 %v1268_v5, %v537_v37 }
  0x1b   :  { %v494_v52 = vrot.slane %v493_v48, 4  ;;  %v1331_v0 = vsel %vm24_vm1, %v25_v32, %v26_v35  ;;  %v59_v49 = vrot.slane %v1325_v39, 3  ;;  %v256_v51 = vrot.slane %v255_v36, 2 }
  0x1c   :  { %v233_v54 = vadd.f32 %v232_v50, %v231_v44  ;;  %v280_v47 = vadd.f32 %v278_v34, %v277_v42  ;;  %v518_v53 = vrot.slane %v517_v41, 2  ;;  %v60_v55 = vrot.slane %v1331_v0, 3 }
  0x1d   :  { %v495_v56 = vadd.f32 %v494_v52, %v493_v48  ;;  %v1335_v48 = vsel %vm24_vm1, %v26_v35, 0.0  ;;  %v542_v52 = vadd.f32 %v540_v38, %v539_v45  ;;  %v257_v63 = vmin.f32 %v255_v36, %v256_v51 }
  0x1e   :  { %v234_v58 = vrot.slane %v233_v54, 2  ;;  %v61_v61 = vsel %vm58_vm2, %v59_v49, %v60_v55  ;;  %v519_v7 = vmin.f32 %v517_v41, %v518_v53  ;;  %v95_v13 = vrot.slane %v1325_v39, 6 }
  0x1f   :  { %v496_v60 = vrot.slane %v495_v56, 2  ;;  %v543_v57 = vmul.f32 0.020408163, %v542_v52  ;;  %v96_v16 = vrot.slane %v1331_v0, 6  ;;  %v98_v17 = vrot.slane %v1335_v48, 6 }
  0x20   :  { %v235_v62 = vadd.f32 %v234_v58, %v233_v54  ;;  %v281_v54 = vmul.f32 0.020408163, %v280_v47  ;;  %v62_v58 = vrot.slane %v1335_v48, 3  ;;  %v258_v21 = vrot.slane %v257_v63, 1 }
  0x21   :  { %v497_v4 = vadd.f32 %v496_v60, %v495_v56  ;;  %1016 = vrot.lane.b32.xlu1 %v1015_v29, %s1206_s23  ;;  %v562_v3 = vrot.slane %v543_v57, 7  ;;  %v97_v23 = vsel %vm94_vm6, %v95_v13, %v96_v16  ;;  %v1367_v24 = vsel %vm94_vm6, %v96_v16, %v98_v17  ;;  %v975_v16 = vld [vmem:[%s1755_s2 + $0x20] sm:$0xff] }
  0x22   :  { %v236_v8 = vrot.slane %v235_v62, 1  ;;  %v300_v60 = vrot.slane %v281_v54, 7  ;;  %v520_v29 = vrot.slane %v519_v7, 1  ;;  %v1050_v30 = vpack.i.bf16 %v1367_v24, %v97_v23 }
  0x23   :  { %v498_v12 = vrot.slane %v497_v4, 1  ;;  %v259_v33 = vmin.f32 %v257_v63, %v258_v21  ;;  %v48_v36 = vrot.slane %v1331_v0, 2  ;;  %v83_v41 = vrot.slane %v1325_v39, 5 }
  0x24   :  { %v237_v15 = vadd.f32 %v236_v8, %v235_v62  ;;  %v1020_v11 = vpack.i.bf16 %v300_v60, %v562_v3  ;;  %v521_v34 = vmin.f32 %v519_v7, %v520_v29  ;;  %v84_v42 = vrot.slane %v1331_v0, 5  ;;  %v667_v60 = vld [vmem:[%s1755_s2 + $0x28] sm:$0xf] }
  0x25   :  { %v499_v18 = vadd.f32 %v498_v12, %v497_v4  ;;  %v1344_v4 = vsel %vm58_vm2, %v60_v55, %v62_v58  ;;  %vm82_vm9 = vcmask 1042432   ;;  %v36_v47 = vrot.slane %v1331_v0, 1 }
  0x26   :  { %v1311_v20 = vmul.f32 0.06666667, %v237_v15  ;;  %v1035_v8 = vpack.i.bf16 %v1344_v4, %v61_v61  ;;  %1021 = vrot.lane.b32.xlu2 %v1020_v11, %s1207_s24  ;;  %v1005_v35 = vpack.i.bf16 %v259_v33, %v521_v34  ;;  %v38_v49 = vrot.slane %v1335_v48, 1 }
  0x27   :  { %v1313_v25 = vmul.f32 0.06666667, %v499_v18  ;;  %v35_v52 = vrot.slane %v1325_v39, 1  ;;  %v675_v61 = vunpack.c.l.b16 %v667_v60  ;;  %v74_v63 = vrot.slane %v1335_v48, 4 }
  0x28   :  { %1171 = vrsqrt.f32 %v1311_v20  ;;  %vm246_vm3 = vcmp.eq.f32.partialorder %v1311_v20, inf  ;;  %vm248_vm4 = vcmp.eq.f32.partialorder %v1311_v20, 0.0  ;;  %v249_v10 = vand.u32 2147483648, %v1311_v20 }
  0x29   :  { %1173 = vrsqrt.f32 %v1313_v25  ;;  %vm508_vm5 = vcmp.eq.f32.partialorder %v1313_v25, inf  ;;  %1036 = vrot.lane.b32.xlu1 %v1035_v8, %s1205_s1  ;;  %v511_v15 = vand.u32 2147483648, %v1313_v25  ;;  %vm510_vm7 = vcmp.eq.f32.partialorder %v1313_v25, 0.0 }
  0x2a   :  { %v39_v53 = vsel %vm24_vm1, %v36_v47, %v38_v49  ;;  %vm70_vm10 = vcmask 1043456   ;;  %v71_v7 = vrot.slane %v1325_v39, 4  ;;  %v107_v29 = vrot.slane %v1325_v39, 7 }
  0x2b   :  { %vm106_vm11 = vcmask 1040384   ;;  %vm176_vm12 = vcmask 64512   ;;  %vm179_vm13 = vcmask 97280   ;;  %vm182_vm14 = vcmask 130048  }
  0x2c   :  { %vm185_vm15 = vcmask 162816  }
  0x2e   :  { %v1172_v40 = vpop.eup %1171 }
  0x2f   :  { %v1174_v43 = vpop.eup %1173  ;;  %v240_v44 = vmul.f32 %v1172_v40, %v1311_v20 }
  0x30   :  { %v502_v46 = vmul.f32 %v1174_v43, %v1313_v25 }
  0x31   :  { %v241_v50 = vmul.f32 %v1172_v40, %v240_v44  ;;  %1051 = vrot.lane.b32.xlu1 %v1050_v30, %s1209_s26  ;;  %v85_v44 = vsel %vm82_vm9, %v83_v41, %v84_v42 }
  0x32   :  { %v503_v1 = vmul.f32 %v1174_v43, %v502_v46 }
  0x33   :  { %v242_v56 = vmul.f32 0.5, %v241_v50  ;;  %v1211_v50 = vmov 0.0  }
  0x34   :  { %v504_v59 = vmul.f32 0.5, %v503_v1  ;;  %v1403_v51 = vrot.slane %v1211_v50, 1  ;;  %v1060_v1 = vpack.i.bf16 %v1335_v48, %v1331_v0  ;;  %v1424_v3 = vrot.slane %v1211_v50, 4 }
  0x35   :  { %v243_v62 = vsub.f32 1.5, %v242_v56  ;;  %v37_v56 = vsel %vm24_vm1, %v35_v52, %v36_v47 }
  0x36   :  { %v505_v6 = vsub.f32 1.5, %v504_v59  ;;  %v126_v54 = vsel %vm24_vm1, %v38_v49, %v1403_v51  ;;  %v1025_v57 = vpack.i.bf16 %v39_v53, %v37_v56  ;;  %v1416_v59 = vrot.slane %v1211_v50, 3 }
  0x37   :  { %v244_v9 = vmul.f32 %v1172_v40, %v243_v62  ;;  %v1065_v55 = vpack.i.bf16 %v126_v54, %v39_v53  ;;  %v72_v62 = vrot.slane %v1331_v0, 4  ;;  %v150_v11 = vsel %vm70_vm10, %v74_v63, %v1424_v3 }
  0x38   :  { %v506_v12 = vmul.f32 %v1174_v43, %v505_v6  ;;  %v86_v43 = vrot.slane %v1335_v48, 5  ;;  %1026 = vrot.lane.b32.xlu2 %v1025_v57, %s1208_s25  ;;  %v142_v6 = vsel %vm58_vm2, %v62_v58, %v1416_v59 }
  0x39   :  { %v245_v14 = vmul.f32 %v244_v9, %v1311_v20  ;;  %1066 = vrot.lane.b32.xlu1 %v1065_v55, %s1213_s29  ;;  %v1075_v8 = vpack.i.bf16 %v142_v6, %v1344_v4  ;;  %v677_v9 = vpack.c.b16 %v675_v61, %v675_v61  ;;  %v73_v13 = vsel %vm70_vm10, %v71_v7, %v72_v62 }
  0x3a   :  { %v507_v18 = vmul.f32 %v506_v12, %v1313_v25  ;;  %v1396_v45 = vsel %vm82_vm9, %v84_v42, %v86_v43  ;;  %v314_v4 = vrot.slane %v1259_v2, 1 }
  0x3b   :  { %v247_v19 = vsel %vm246_vm3, %v1311_v20, %v245_v14  ;;  %v47_v20 = vrot.slane %v1325_v39, 2  ;;  %v1045_v46 = vpack.i.bf16 %v1396_v45, %v85_v44  ;;  %v683_v14 = vsel %vm70_vm10, %v677_v9, 0 }
  0x3c   :  { %v250_v27 = vsel %vm248_vm4, %v249_v10, %v247_v19  ;;  %v509_v28 = vsel %vm508_vm5, %v1313_v25, %v507_v18  ;;  %v50_v25 = vrot.slane %v1335_v48, 2  ;;  %v75_v10 = vsel %vm70_vm10, %v72_v62, %v74_v63  ;;  %691 = vmatpush.bf16.msra.mxu1 %v683_v14 }
  0x3d   :  { %v512_v31 = vsel %vm510_vm7, %v511_v15, %v509_v28  ;;  %v49_v37 = vsel %vm46_vm8, %v47_v20, %v48_v36  ;;  %v1080_v12 = vpack.i.bf16 %v150_v11, %v75_v10  ;;  %v1040_v58 = vpack.i.bf16 %v75_v10, %v73_v13 }
  0x3e   :  { %v1000_v32 = vpack.i.bf16 %v250_v27, %v512_v31  ;;  %v1385_v38 = vsel %vm46_vm8, %v48_v36, %v50_v25  ;;  %v315_v15 = vrot.slane %v1268_v5, 1  ;;  %v1446_v18 = vrot.slane %v1211_v50, 6 }
  0x3f   :  { %v1030_v40 = vpack.i.bf16 %v1385_v38, %v49_v37  ;;  %v1449_v19 = vsel %vm24_vm1, 0.0, %v314_v4  ;;  %v108_v31 = vrot.slane %v1331_v0, 7  ;;  %vm194_vm3 = vcmask 261120  }
  0x40   :  { %1001 = vrot.lane.b32.xlu0 %v1000_v32, %s1208_s25  ;;  %1041 = vrot.lane.b32.xlu2 %v1040_v58, %s1206_s23  ;;  %v1452_v21 = vsel %vm24_vm1, %v314_v4, %v315_v15  ;;  %v1455_v23 = vsel %vm24_vm1, %v315_v15, 0.0  ;;  %v324_v2 = vrot.slane %v1449_v19, 1  ;;  %v166_v5 = vsel %vm94_vm6, %v98_v17, %v1446_v18 }
  0x41   :  { %1081 = vrot.lane.b32.xlu1 %v1080_v12, %s1215_s7  ;;  %692 = vmatpush.bf16.msra.mxu1 %v975_v16  ;;  %v325_v27 = vrot.slane %v1452_v21, 1  ;;  %v327_v28 = vrot.slane %v1455_v23, 1  ;;  %v1090_v30 = vpack.i.bf16 %v166_v5, %v1367_v24  ;;  %v110_v32 = vrot.slane %v1335_v48, 7 }
  0x42   :  { %v346_v24 = vrot.slane %v1449_v19, 3  ;;  %v347_v37 = vrot.slane %v1452_v21, 3  ;;  %v357_v41 = vrot.slane %v1449_v19, 4  ;;  %v358_v42 = vrot.slane %v1452_v21, 4 }
  0x43   :  { %v326_v33 = vsel %vm24_vm1, %v324_v2, %v325_v27  ;;  %v1470_v34 = vsel %vm24_vm1, %v325_v27, %v327_v28  ;;  %v111_v20 = vsel %vm106_vm11, %v108_v31, %v110_v32  ;;  %v360_v44 = vrot.slane %v1455_v23, 4 }
  0x44   :  { %v1095_v17 = vpack.i.bf16 %v1470_v34, %v326_v33  ;;  %v348_v47 = vsel %vm58_vm2, %v346_v24, %v347_v37  ;;  %v379_v55 = vrot.slane %v1449_v19, 6  ;;  %v380_v56 = vrot.slane %v1452_v21, 6 }
  0x45   :  { %v1496_v53 = vsel %vm70_vm10, %v358_v42, %v360_v44  ;;  %v382_v57 = vrot.slane %v1455_v23, 6  ;;  %v390_v63 = vrot.slane %v1449_v19, 7  ;;  %v391_v6 = vrot.slane %v1452_v21, 7 }
  0x46   :  { %v393_v7 = vrot.slane %v1455_v23, 7  ;;  %v336_v58 = vrot.slane %v1452_v21, 2  ;;  %v338_v4 = vrot.slane %v1455_v23, 2  ;;  %v335_v15 = vrot.slane %v1449_v19, 2 }
  0x47   :  { %v1517_v9 = vsel %vm94_vm6, %v380_v56, %v382_v57  ;;  %v407_v5 = vsel %vm24_vm1, %v327_v28, %v1403_v51  ;;  %vm188_vm1 = vcmask 195584   ;;  %vm197_vm4 = vcmask 293888  }
  0x48   :  { %1006 = vrot.lane.b32.xlu0 %v1005_v35, %s1210_s27  ;;  %v109_v35 = vsel %vm106_vm11, %v107_v29, %v108_v31  ;;  %v394_v10 = vsel %vm106_vm11, %v391_v6, %v393_v7  ;;  %v337_v31 = vsel %vm46_vm8, %v335_v15, %v336_v58  ;;  %v1135_v28 = vpack.i.bf16 %v407_v5, %v1470_v34 }
  0x49   :  { %v1055_v36 = vpack.i.bf16 %v111_v20, %v109_v35  ;;  %1096 = vrot.lane.b32.xlu1 %v1095_v17, %s1208_s25  ;;  %v371_v34 = vrot.slane %v1455_v23, 5  ;;  %vm200_vm5 = vcmask 326656   ;;  %vm209_vm7 = vcmask 424960  }
  0x4b   :  { %1056 = vrot.lane.b32.xlu2 %v1055_v36, %s1217_s11 }
  0x50   :  { %1031 = vrot.lane.b32.xlu0 %v1030_v40, %s1210_s27  ;;  %v349_v40 = vrot.slane %v1455_v23, 3 }
  0x52   :  { %v1489_v49 = vsel %vm58_vm2, %v347_v37, %v349_v40 }
  0x53   :  { %v1105_v52 = vpack.i.bf16 %v1489_v49, %v348_v47  ;;  %v369_v47 = vrot.slane %v1452_v21, 5 }
  0x58   :  { %1046 = vrot.lane.b32.xlu0 %v1045_v46, %s1207_s24  ;;  %v133_v46 = vrot.slane %v1211_v50, 2 }
  0x5a   :  { %v134_v54 = vsel %vm46_vm8, %v50_v25, %v133_v46  ;;  %v1511_v25 = vrot.slane %v1211_v50, 5 }
  0x5b   :  { %v1070_v62 = vpack.i.bf16 %v134_v54, %v1385_v38  ;;  %v392_v38 = vsel %vm106_vm11, %v390_v63, %v391_v6 }
  0x5c   :  { %v158_v12 = vsel %vm82_vm9, %v86_v43, %v1511_v25  ;;  %v1125_v13 = vpack.i.bf16 %v394_v10, %v392_v38  ;;  %v435_v63 = vsel %vm82_vm9, %v371_v34, %v1511_v25  ;;  %v1130_v25 = vpack.i.bf16 %v1455_v23, %v1452_v21 }
  0x5d   :  { %1071 = vrot.lane.b32.xlu2 %v1070_v62, %s1218_s12  ;;  %v1085_v14 = vpack.i.bf16 %v158_v12, %v1396_v45  ;;  %v339_v45 = vsel %vm46_vm8, %v336_v58, %v338_v4  ;;  %v372_v62 = vsel %vm82_vm9, %v369_v47, %v371_v34 }
  0x5e   :  { %v1155_v38 = vpack.i.bf16 %v435_v63, %v372_v62 }
  0x60   :  { %1061 = vrot.lane.b32.xlu0 %v1060_v1, %s1212_s28  ;;  %v359_v1 = vsel %vm70_vm10, %v357_v41, %v358_v42  ;;  %v1100_v41 = vpack.i.bf16 %v339_v45, %v337_v31 }
  0x61   :  { %v1110_v60 = vpack.i.bf16 %v1496_v53, %v359_v1 }
  0x63   :  { %1111 = vrot.lane.b32.xlu1 %v1110_v60, %s1206_s23 }
  0x65   :  { %1086 = vrot.lane.b32.xlu2 %v1085_v14, %s1219_s13 }
  0x68   :  { %1076 = vrot.lane.b32.xlu0 %v1075_v8, %s1214_s6  ;;  %v381_v8 = vsel %vm94_vm6, %v379_v55, %v380_v56  ;;  %v428_v56 = vsel %vm70_vm10, %v360_v44, %v1424_v3 }
  0x69   :  { %v1120_v50 = vpack.i.bf16 %v1517_v9, %v381_v8  ;;  %v1150_v7 = vpack.i.bf16 %v428_v56, %v1496_v53  ;;  %v421_v53 = vsel %vm58_vm2, %v349_v40, %v1416_v59  ;;  %vm191_vm2 = vcmask 228352  }
  0x6b   :  { %1126 = vrot.lane.b32.xlu1 %v1125_v13, %s1217_s11  ;;  %s901_s11 = sshll.u32 %s1757_s4, 4  ;;  %s902_s11 = int_to_ptr.hbm [resolvable:$true] %s901_s11 }
  0x6d   :  { %1101 = vrot.lane.b32.xlu2 %v1100_v41, %s1210_s27 }
  0x70   :  { %1091 = vrot.lane.b32.xlu0 %v1090_v30, %s1216_s10  ;;  %v414_v30 = vsel %vm46_vm8, %v338_v4, %v133_v46 }
  0x71   :  { %v1140_v37 = vpack.i.bf16 %v414_v30, %v339_v45 }
  0x73   :  { %1141 = vrot.lane.b32.xlu1 %v1140_v37, %s1218_s12 }
  0x78   :  { %1106 = vrot.lane.b32.xlu0 %v1105_v52, %s1205_s1 }
  0x7b   :  { %1156 = vrot.lane.b32.xlu1 %v1155_v38, %s1219_s13 }
  0x80   :  { %1121 = vrot.lane.b32.xlu0 %v1120_v50, %s1209_s26  ;;  %v1022_v2 = vpop.permute.xlu2 %1021  ;;  %v442_v50 = vsel %vm94_vm6, %v382_v57, %v1446_v18  ;;  %v974_v18 = vld [vmem:[%s1755_s2 + $0x18] sm:$0x30]  ;;  %vm203_vm6 = vcmask 359424  }
  0x81   :  { %v1023_v51 = vunpack.i.l.bf16 %v1022_v2  ;;  %v1024_v54 = vunpack.i.h.bf16 %v1022_v2  ;;  %v1160_v12 = vpack.i.bf16 %v442_v50, %v1517_v9  ;;  %v926_v2 = vld [vmem:[%s1755_s2 + $0x18] sm:$0xf] }
  0x82   :  { %v927_v23 = vor.u32 %v974_v18, %v926_v2 }
  0x88   :  { %1136 = vrot.lane.b32.xlu0 %v1135_v28, %s1213_s29 }
  0x8b   :  { %v1012_v61 = vpop.permute.xlu1 %1011 }
  0x8c   :  { %v1014_v43 = vunpack.i.h.bf16 %v1012_v61  ;;  %v1013_v29 = vunpack.i.l.bf16 %v1012_v61 }
  0x90   :  { %1151 = vrot.lane.b32.xlu0 %v1150_v7, %s1215_s7 }
  0x92   :  { %v1027_v13 = vpop.permute.xlu2 %1026 }
  0x93   :  { %v1017_v16 = vpop.permute.xlu1 %1016  ;;  %v1029_v59 = vunpack.i.h.bf16 %v1027_v13  ;;  %v1028_v40 = vunpack.i.l.bf16 %v1027_v13  ;;  %v702_v13 = vld [vmem:[%s1755_s2 + $0x38] sm:$0xf] }
  0x94   :  { %v1019_v33 = vunpack.i.h.bf16 %v1017_v16  ;;  %v1018_v20 = vunpack.i.l.bf16 %v1017_v16 }
  0x95   :  { %v175_v5 = vsel %vm173_vm0, %v1331_v0, %v1029_v59 }
  0x9a   :  { %v1042_v4 = vpop.permute.xlu2 %1041 }
  0x9b   :  { %v1037_v58 = vpop.permute.xlu1 %1036 }
  0xa3   :  { %v1052_v16 = vpop.permute.xlu1 %1051 }
  0xa4   :  { %v1054_v37 = vunpack.i.h.bf16 %v1052_v16  ;;  %v1053_v41 = vunpack.i.l.bf16 %v1052_v16 }
  0xb2   :  { %v1002_v11 = vpop.permute.xlu0 %1001 }
  0xb3   :  { %v1004_v48 = vunpack.i.h.bf16 %v1002_v11  ;;  %v1003_v27 = vunpack.i.l.bf16 %v1002_v11  ;;  %v1145_v11 = vpack.i.bf16 %v421_v53, %v1489_v49  ;;  %v1057_v49 = vpop.permute.xlu2 %1056 }
  0xb5   :  { %v304_v24 = vsel %vm173_vm0, %v1274_v22, %v1004_v48  ;;  %v566_v36 = vsel %vm173_vm0, %v1282_v26, %v1003_v27  ;;  %v368_v22 = vrot.slane %v1449_v19, 5  ;;  %v174_v48 = vsel %vm173_vm0, %v1325_v39, %v1028_v40 }
  0xb6   :  { %v618_v27 = vsel %vm46_vm8, %v927_v23, 0  ;;  %vm212_vm8 = vcmask 457728  }
  0xb7   :  { %v370_v8 = vsel %vm82_vm9, %v368_v22, %v369_v47  ;;  %624 = vmatpush.bf16.msra.mxu0 %v618_v27  ;;  %vm610_vm9 = vcmask 490496  }
  0xb8   :  { %v1115_v10 = vpack.i.bf16 %v372_v62, %v370_v8 }
  0xba   :  { %v1007_v32 = vpop.permute.xlu0 %1006  ;;  %1116 = vrot.lane.b32.xlu2 %v1115_v10, %s1207_s24  ;;  %s741_s24 = ssub.f32 1.0, %s737_s22 }
  0xbb   :  { %v1009_v17 = vunpack.i.h.bf16 %v1007_v32  ;;  %v1008_v35 = vunpack.i.l.bf16 %v1007_v32  ;;  %v1067_v32 = vpop.permute.xlu1 %1066  ;;  %v1072_v28 = vpop.permute.xlu2 %1071 }
  0xbc   :  { %v1069_v62 = vunpack.i.h.bf16 %v1067_v32  ;;  %v1068_v63 = vunpack.i.l.bf16 %v1067_v32  ;;  %v1074_v53 = vunpack.i.h.bf16 %v1072_v28 }
  0xbd   :  { %v305_v42 = vsel %vm176_vm12, %v304_v24, %v1009_v17  ;;  %v567_v46 = vsel %vm176_vm12, %v566_v36, %v1008_v35 }
  0xbe   :  { %v306_v52 = vsel %vm179_vm13, %v305_v42, %v1014_v43  ;;  %v568_v1 = vsel %vm179_vm13, %v567_v46, %v1013_v29  ;;  %v1039_v43 = vunpack.i.h.bf16 %v1037_v58  ;;  %v1038_v29 = vunpack.i.l.bf16 %v1037_v58 }
  0xbf   :  { %v307_v26 = vsel %vm182_vm14, %v306_v52, %v1019_v33  ;;  %v569_v55 = vsel %vm182_vm14, %v568_v1, %v1018_v20  ;;  %v1044_v33 = vunpack.i.h.bf16 %v1042_v4  ;;  %v1059_v52 = vunpack.i.h.bf16 %v1057_v49 }
  0xc0   :  { %v570_v60 = vsel %vm185_vm15, %v569_v55, %v1023_v51  ;;  %v308_v6 = vsel %vm185_vm15, %v307_v26, %v1024_v54  ;;  %v1043_v51 = vunpack.i.l.bf16 %v1042_v4  ;;  %v1058_v1 = vunpack.i.l.bf16 %v1057_v49 }
  0xc1   :  { %v572_v61 = vrot.slane %v570_v60, 7  ;;  %v710_v4 = vunpack.c.l.b16 %v702_v13 }
  0xc2   :  { %1131 = vrot.lane.b32.xlu2 %v1130_v25, %s1212_s28  ;;  %v1032_v14 = vpop.permute.xlu0 %1031 }
  0xc3   :  { %v574_v3 = vsel %vm106_vm11, %v308_v6, %v572_v61  ;;  %v1034_v57 = vunpack.i.h.bf16 %v1032_v14  ;;  %v1033_v9 = vunpack.i.l.bf16 %v1032_v14  ;;  %v1607_v42 = vpop.permute.xlu1 %1081  ;;  %v1611_v34 = vpop.permute.xlu2 %1086  ;;  %v712_v40 = vpack.c.b16 %v710_v4, %v710_v4 }
  0xc4   :  { %v664_v44 = vpack.c.bf16 %v574_v3, %v574_v3 }
  0xc5   :  { %v177_v30 = vsel %vm176_vm12, %v174_v48, %v1033_v9  ;;  %v178_v31 = vsel %vm176_vm12, %v175_v5, %v1034_v57  ;;  %v1084_v57 = vunpack.i.h.bf16 %v1607_v42  ;;  %v1083_v9 = vunpack.i.l.bf16 %v1607_v42 }
  0xc6   :  { %934 = vmatmul.msk.bf16.vlgmr.msra.gmra.mxu1 %vm188_vm1, %v664_v44  ;;  %v180_v17 = vsel %vm179_vm13, %v177_v30, %v1038_v29  ;;  %v181_v0 = vsel %vm179_vm13, %v178_v31, %v1039_v43  ;;  %v718_v48 = vsel %vm70_vm10, %v712_v40, 0  ;;  %v973_v31 = vld [vmem:[%s1755_s2 + $0x10] sm:$0xff]  ;;  %vm795_vm10 = vcmask 523264  }
  0xc7   :  { %v183_v20 = vsel %vm182_vm14, %v180_v17, %v1043_v51  ;;  %v184_v24 = vsel %vm182_vm14, %v181_v0, %v1044_v33  ;;  %726 = vmatpush.bf16.msra.mxu2 %v718_v48  ;;  %625 = vmatpush.bf16.msra.mxu0 %v973_v31 }
  0xca   :  { %1146 = vrot.lane.b32.xlu2 %v1145_v11, %s1214_s6  ;;  %v1047_v15 = vpop.permute.xlu0 %1046  ;;  %v1073_v11 = vunpack.i.l.bf16 %v1072_v28 }
  0xcb   :  { %v1049_v35 = vunpack.i.h.bf16 %v1047_v15  ;;  %v1048_v39 = vunpack.i.l.bf16 %v1047_v15  ;;  %v1097_v6 = vpop.permute.xlu1 %1096  ;;  %v1102_v38 = vpop.permute.xlu2 %1101 }
  0xcc   :  { %v1099_v3 = vunpack.i.h.bf16 %v1097_v6  ;;  %v1098_v44 = vunpack.i.l.bf16 %v1097_v6  ;;  %v1104_v10 = vunpack.i.h.bf16 %v1102_v38  ;;  %v1103_v25 = vunpack.i.l.bf16 %v1102_v38  ;;  %v971_v6 = vld [vmem:[%s1755_s2] sm:$0xff] }
  0xcd   :  { %v186_v46 = vsel %vm185_vm15, %v183_v20, %v1048_v39  ;;  %v187_v47 = vsel %vm185_vm15, %v184_v24, %v1049_v35  ;;  %v976_v35 = vld [vmem:[%s1755_s2 + $0x30] sm:$0xff]  ;;  %v1089_v39 = vunpack.i.h.bf16 %v1611_v34  ;;  %v1088_v20 = vunpack.i.l.bf16 %v1611_v34 }
  0xce   :  { %v189_v54 = vsel %vm188_vm1, %v186_v46, %v1053_v41  ;;  %v190_v22 = vsel %vm188_vm1, %v187_v47, %v1054_v37  ;;  %v450_v50 = vsel %vm173_vm0, %v1452_v21, %v1099_v3  ;;  %727 = vmatpush.bf16.msra.mxu2 %v976_v35  ;;  %v972_v37 = vld [vmem:[%s1755_s2 + $0x8] sm:$0xff] }
  0xcf   :  { %v192_v56 = vsel %vm191_vm2, %v189_v54, %v1058_v1  ;;  %v193_v60 = vsel %vm191_vm2, %v190_v22, %v1059_v52  ;;  %v452_v21 = vsel %vm176_vm12, %v450_v50, %v1104_v10  ;;  %626 = vmatpush.bf16.msra.mxu0 %v972_v37  ;;  %v979_v37 = vld [vmem:[%s1755_s2 + $0x50] sm:$0xff] }
  0xd2   :  { %1161 = vrot.lane.b32.xlu2 %v1160_v12, %s1216_s10  ;;  %v1062_v45 = vpop.permute.xlu0 %1061  ;;  %v449_v12 = vsel %vm173_vm0, %v1449_v19, %v1098_v44  ;;  %vm206_vm0 = vcmask 392192  }
  0xd3   :  { %v1064_v26 = vunpack.i.h.bf16 %v1062_v45  ;;  %v1063_v55 = vunpack.i.l.bf16 %v1062_v45  ;;  %v451_v59 = vsel %vm176_vm12, %v449_v12, %v1103_v25  ;;  %627 = vmatpush.bf16.msra.mxu0 %v971_v6 }
  0xd5   :  { %v195_v7 = vsel %vm194_vm3, %v192_v56, %v1063_v55  ;;  %v196_v8 = vsel %vm194_vm3, %v193_v60, %v1064_v26  ;;  %v1112_v5 = vpop.permute.xlu1 %1111 }
  0xd6   :  { %v198_v14 = vsel %vm197_vm4, %v195_v7, %v1068_v63  ;;  %v199_v58 = vsel %vm197_vm4, %v196_v8, %v1069_v62  ;;  %v1114_v29 = vunpack.i.h.bf16 %v1112_v5  ;;  %v1113_v45 = vunpack.i.l.bf16 %v1112_v5 }
  0xd7   :  { %v201_v49 = vsel %vm200_vm5, %v198_v14, %v1073_v11  ;;  %v202_v2 = vsel %vm200_vm5, %v199_v58, %v1074_v53 }
  0xda   :  { %v1605_v36 = vpop.permute.xlu0 %1076 }
  0xdb   :  { %v1079_v15 = vunpack.i.h.bf16 %v1605_v36  ;;  %v1078_v16 = vunpack.i.l.bf16 %v1605_v36 }
  0xdd   :  { %v204_v32 = vsel %vm203_vm6, %v201_v49, %v1078_v16  ;;  %v205_v33 = vsel %vm203_vm6, %v202_v2, %v1079_v15  ;;  %v1127_v26 = vpop.permute.xlu1 %1126 }
  0xde   :  { %v207_v24 = vsel %vm206_vm0, %v204_v32, %v1083_v9  ;;  %v208_v36 = vsel %vm206_vm0, %v205_v33, %v1084_v57  ;;  %v1129_v60 = vunpack.i.h.bf16 %v1127_v26  ;;  %v1128_v62 = vunpack.i.l.bf16 %v1127_v26  ;;  %v1166_v26 = vld [vmem:[%s1756_s3] ss:$0 sm:$0xff] }
  0xdf   :  { %v210_v54 = vsel %vm209_vm7, %v207_v24, %v1088_v20  ;;  %v211_v22 = vsel %vm209_vm7, %v208_v36, %v1089_v39  ;;  %v980_v36 = vld [vmem:[%s1755_s2 + $0x58] sm:$0xff] }
  0xe0   :  { %803 = vmatpush.bf16.msra.mxu3 %v980_v36  ;;  %v1169_v36 = vld [vmem:[%s1756_s3 + $0x20] ss:$0 sm:$0xff] }
  0xe2   :  { %v1617_v61 = vpop.permute.xlu0 %1091 }
  0xe3   :  { %v1094_v47 = vunpack.i.h.bf16 %v1617_v61  ;;  %v1093_v52 = vunpack.i.l.bf16 %v1617_v61 }
  0xe4   :  { %804 = vmatpush.bf16.msra.mxu3 %v979_v37 }
  0xe5   :  { %v213_v44 = vsel %vm212_vm8, %v210_v54, %v1093_v52  ;;  %v214_v38 = vsel %vm212_vm8, %v211_v22, %v1094_v47  ;;  %v1142_v13 = vpop.permute.xlu1 %1141 }
  0xe6   :  { %v575_v10 = vpack.c.bf16 %v214_v38, %v213_v44  ;;  %v1144_v4 = vunpack.i.h.bf16 %v1142_v13  ;;  %v1143_v15 = vunpack.i.l.bf16 %v1142_v13  ;;  %v982_v13 = vld [vmem:[%s1755_s2 + $0x68] sm:$0xff] }
  0xe7   :  { %843 = vmatpush.bf16.msrb.mxu1 %v982_v13 }
  0xe8   :  { %928 = vmatmul.msk.bf16.vlgmr.msra.gmra.mxu0 %vm610_vm9, %v575_v10 }
  0xea   :  { %v1107_v19 = vpop.permute.xlu0 %1106 }
  0xeb   :  { %v1109_v18 = vunpack.i.h.bf16 %v1107_v19  ;;  %v1108_v23 = vunpack.i.l.bf16 %v1107_v19 }
  0xed   :  { %v453_v27 = vsel %vm179_vm13, %v451_v59, %v1108_v23  ;;  %v454_v43 = vsel %vm179_vm13, %v452_v21, %v1109_v18  ;;  %v1157_v9 = vpop.permute.xlu1 %1156 }
  0xee   :  { %v455_v17 = vsel %vm182_vm14, %v453_v27, %v1113_v45  ;;  %v456_v0 = vsel %vm182_vm14, %v454_v43, %v1114_v29  ;;  %v1159_v27 = vunpack.i.h.bf16 %v1157_v9  ;;  %v1158_v43 = vunpack.i.l.bf16 %v1157_v9 }
  0xf2   :  { %v1122_v46 = vpop.permute.xlu0 %1121 }
  0xf3   :  { %v1124_v34 = vunpack.i.h.bf16 %v1122_v46  ;;  %v1123_v1 = vunpack.i.l.bf16 %v1122_v46 }
  0xfa   :  { %v1137_v11 = vpop.permute.xlu0 %1136 }
  0xfb   :  { %v1139_v50 = vunpack.i.h.bf16 %v1137_v11  ;;  %v1138_v12 = vunpack.i.l.bf16 %v1137_v11 }
 0x102   :  { %v1152_v18 = vpop.permute.xlu0 %1151 }
 0x103   :  { %v1154_v23 = vunpack.i.h.bf16 %v1152_v18  ;;  %v1153_v57 = vunpack.i.l.bf16 %v1152_v18 }
 0x114   :  { %v1117_v30 = vpop.permute.xlu2 %1116 }
 0x115   :  { %v1119_v51 = vunpack.i.h.bf16 %v1117_v30  ;;  %v1118_v28 = vunpack.i.l.bf16 %v1117_v30 }
 0x117   :  { %v457_v41 = vsel %vm185_vm15, %v455_v17, %v1118_v28  ;;  %v458_v42 = vsel %vm185_vm15, %v456_v0, %v1119_v51  ;;  %v1165_v17 = vld [vmem:[%s1756_s3 + $0x8] ss:$0 sm:$0xff] }
 0x118   :  { %v459_v55 = vsel %vm188_vm1, %v457_v41, %v1123_v1  ;;  %v460_v56 = vsel %vm188_vm1, %v458_v42, %v1124_v34  ;;  %v978_v41 = vld [vmem:[%s1755_s2 + $0x48] sm:$0xff]  ;;  %v1167_v42 = vld [vmem:[%s1756_s3 + $0x10] ss:$0 sm:$0xff] }
 0x119   :  { %v461_v8 = vsel %vm191_vm2, %v459_v55, %v1128_v62  ;;  %v462_v3 = vsel %vm191_vm2, %v460_v56, %v1129_v60  ;;  %805 = vmatpush.bf16.msra.mxu3 %v978_v41 }
 0x11c   :  { %v1132_v63 = vpop.permute.xlu2 %1131 }
 0x11d   :  { %v1134_v61 = vunpack.i.h.bf16 %v1132_v63  ;;  %v1133_v7 = vunpack.i.l.bf16 %v1132_v63 }
 0x11f   :  { %v463_v25 = vsel %vm194_vm3, %v461_v8, %v1133_v7  ;;  %v464_v53 = vsel %vm194_vm3, %v462_v3, %v1134_v61 }
 0x120   :  { %v465_v14 = vsel %vm197_vm4, %v463_v25, %v1138_v12  ;;  %v466_v58 = vsel %vm197_vm4, %v464_v53, %v1139_v50  ;;  %v977_v25 = vld [vmem:[%s1755_s2 + $0x40] sm:$0xff] }
 0x121   :  { %v467_v19 = vsel %vm200_vm5, %v465_v14, %v1143_v15  ;;  %v468_v40 = vsel %vm200_vm5, %v466_v58, %v1144_v4  ;;  %806 = vmatpush.bf16.msra.mxu3 %v977_v25 }
 0x124   :  { %v1147_v16 = vpop.permute.xlu2 %1146 }
 0x125   :  { %v1149_v21 = vunpack.i.h.bf16 %v1147_v16  ;;  %v1148_v59 = vunpack.i.l.bf16 %v1147_v16 }
 0x127   :  { %v469_v49 = vsel %vm203_vm6, %v467_v19, %v1148_v59  ;;  %v470_v2 = vsel %vm203_vm6, %v468_v40, %v1149_v21 }
 0x128   :  { %v471_v5 = vsel %vm206_vm0, %v469_v49, %v1153_v57  ;;  %v472_v48 = vsel %vm206_vm0, %v470_v2, %v1154_v23 }
 0x129   :  { %v473_v31 = vsel %vm209_vm7, %v471_v5, %v1158_v43  ;;  %v474_v32 = vsel %vm209_vm7, %v472_v48, %v1159_v27  ;;  %v981_v48 = vld [vmem:[%s1755_s2 + $0x60] sm:$0xff]  ;;  %v983_v27 = vld [vmem:[%s1755_s2 + $0x70] sm:$0xff] }
 0x12a   :  { %844 = vmatpush.bf16.msrb.mxu1 %v981_v48  ;;  %872 = vmatpush.bf16.msrb.mxu2 %v983_v27  ;;  %v738_v43 = vld [vmem:[%s1756_s3 + $0x30] sm:$0x3] }
 0x12c   :  { %v1162_v29 = vpop.permute.xlu2 %1161 }
 0x12d   :  { %v1164_v45 = vunpack.i.h.bf16 %v1162_v29  ;;  %v1163_v30 = vunpack.i.l.bf16 %v1162_v29  ;;  %v742_v29 = vstv %s741_s24 }
 0x12f   :  { %v475_v33 = vsel %vm212_vm8, %v473_v31, %v1163_v30  ;;  %v476_v51 = vsel %vm212_vm8, %v474_v32, %v1164_v45  ;;  %v743_v45 = vmul.f32 %v742_v29, %v738_v43  ;;  %v739_v30 = vstv %s737_s22 }
 0x130   :  { %v576_v28 = vpack.c.bf16 %v476_v51, %v475_v33  ;;  %v740_v31 = vmul.f32 %v739_v30, %v738_v43  ;;  %v1168_v51 = vld [vmem:[%s1756_s3 + $0x18] ss:$0 sm:$0xff] }
 0x131   :  { %v745_v32 = vrot.slane %v743_v45, 1 }
 0x132   :  { %929 = vmatmul.msk.bf16.gmra.mxu0 %vm610_vm9, %v576_v28 }
 0x133   :  { %v747_v33 = vadd.f32 %v745_v32, %v740_v31 }
 0x135   :  { %v812_v28 = vperm.slane %v747_v33, 0 }
 0x143   :  { %v694_v0 = vpop.f32.mrf.mxu1 }
 0x144   :  { %v695_v35 = vadd.f32 %v1165_v17, %v694_v0 }
 0x146   :  { %v698_v39 = vmax.f32 %v695_v35, 0.0 }
 0x148   :  { %v699_v20 = vpack.c.bf16 %v698_v39, %v698_v39 }
 0x14a   :  { %939 = vmatmul.msk.bf16.vlgmr.msra.gmra.mxu2 %vm188_vm1, %v699_v20 }
 0x14b   :  { %v696_v24 = vpop.f32.mrf.mxu1 }
 0x165   :  { %v629_v1 = vpop.f32.mrf.mxu0 }
 0x166   :  { %v630_v56 = vadd.f32 %v1166_v26, %v629_v1 }
 0x168   :  { %v639_v6 = vmax.f32 %v630_v56, 0.0 }
 0x16a   :  { %v643_v3 = vsel %vm206_vm0, %v639_v6, 0.0 }
 0x16d   :  { %v631_v54 = vpop.f32.mrf.mxu0 }
 0x16e   :  { %v632_v60 = vadd.f32 %v1166_v26, %v631_v54 }
 0x170   :  { %v640_v61 = vmax.f32 %v632_v60, 0.0 }
 0x172   :  { %v644_v44 = vsel %vm206_vm0, %v640_v61, 0.0 }
 0x173   :  { %v645_v53 = vadd.f32 %v644_v44, %v643_v3 }
 0x175   :  { %v646_v50 = vrot.slane %v645_v53, 4 }
 0x177   :  { %v647_v14 = vadd.f32 %v646_v50, %v645_v53 }
 0x179   :  { %v648_v4 = vrot.slane %v647_v14, 2 }
 0x17b   :  { %v649_v16 = vadd.f32 %v648_v4, %v647_v14 }
 0x17d   :  { %v650_v59 = vrot.slane %v649_v16, 1 }
 0x17f   :  { %v651_v40 = vadd.f32 %v650_v59, %v649_v16 }
 0x181   :  { %v652_v2 = vmul.f32 0.0625, %v651_v40 }
 0x1af   :  { %v634_v22 = vpop.f32.mrf.mxu0 }
 0x1b0   :  { %v635_v62 = vadd.f32 %v1166_v26, %v634_v22 }
 0x1b2   :  { %v641_v7 = vmax.f32 %v635_v62, 0.0 }
 0x1b4   :  { %v653_v38 = vsel %vm206_vm0, %v641_v7, 0.0 }
 0x1b7   :  { %v636_v55 = vpop.f32.mrf.mxu0 }
 0x1b8   :  { %v637_v63 = vadd.f32 %v1166_v26, %v636_v55  ;;  %v1170_v26 = vld [vmem:[%s1756_s3 + $0x28] ss:$0 sm:$0xff] }
 0x1ba   :  { %v642_v8 = vmax.f32 %v637_v63, 0.0 }
 0x1bc   :  { %v654_v10 = vsel %vm206_vm0, %v642_v8, 0.0 }
 0x1bd   :  { %v655_v11 = vadd.f32 %v654_v10, %v653_v38 }
 0x1bf   :  { %v656_v12 = vrot.slane %v655_v11, 4 }
 0x1c1   :  { %v657_v58 = vadd.f32 %v656_v12, %v655_v11 }
 0x1c3   :  { %v658_v15 = vrot.slane %v657_v58, 2 }
 0x1c5   :  { %v659_v21 = vadd.f32 %v658_v15, %v657_v58 }
 0x1c7   :  { %v660_v19 = vrot.slane %v659_v21, 1 }
 0x1c9   :  { %v661_v49 = vadd.f32 %v660_v19, %v659_v21 }
 0x1cb   :  { %v662_v18 = vmul.f32 0.0625, %v661_v49 }
 0x1cd   :  { %v729_v46 = vpop.f32.mrf.mxu2  ;;  %v663_v57 = vsel %vm106_vm11, %v652_v2, %v662_v18  ;;  %vm881_vm11 = vcmask 9216  }
 0x1ce   :  { %v730_v47 = vadd.f32 %v1167_v42, %v729_v46 }
 0x1d0   :  { %v733_v52 = vmax.f32 %v730_v47, 0.0 }
 0x1d2   :  { %756 = vrot.lane.b32.xlu0 %v733_v52, %s1215_s7  ;;  %v748_v52 = vld [vmem:[%s1756_s3 + $0x38] sm:$0x3]  ;;  %s1220_s3 = smov [#allocation3]  }
 0x1d3   :  { %v749_v1 = vmul.f32 %v748_v52, %v739_v30  ;;  %s899_s8 = sshll.u32 %s1220_s3, 4  ;;  %s900_s8 = int_to_ptr.vmem [resolvable:$true] %s899_s8 }
 0x1d5   :  { %v731_v34 = vpop.f32.mrf.mxu2 }
 0x1d6   :  { %v750_v34 = vmul.f32 %v748_v52, %v742_v29 }
 0x1d8   :  { %v752_v54 = vrot.slane %v750_v34, 1 }
 0x1da   :  { %v754_v22 = vadd.f32 %v752_v54, %v749_v1 }
 0x1dc   :  { %v878_v55 = vperm.slane %v754_v22, 0 }
 0x244   :  { %v757_v23 = vpop.permute.xlu0 %756 }
 0x245   :  { %v759_v9 = vsel %vm206_vm0, %v663_v57, %v757_v23 }
 0x246   :  { %v760_v5 = vpack.c.bf16 %v759_v9, %v759_v9 }
 0x248   :  { %956 = vmatmul.msk.bf16.vlgmr.msra.gmra.mxu3 %vm795_vm10, %v760_v5 }
 0x2cb   :  { %v808_v17 = vpop.f32.mrf.mxu3 }
 0x2cc   :  { %v809_v0 = vadd.f32 %v1168_v51, %v808_v17 }
 0x2ce   :  { %v813_v35 = vadd.f32 %v812_v28, %v809_v0 }
 0x2d0   :  { %v814_v39 = vmax.f32 %v813_v35, 0.0 }
 0x2d2   :  { %v815_v20 = vpack.c.bf16 %v814_v39, %v814_v39 }
 0x2d3   :  { %v810_v24 = vpop.f32.mrf.mxu3 }
 0x2d4   :  { %965 = vmatmul.msk.bf16.vlgmr.msrb.gmra.mxu1 %vm194_vm3, %v815_v20 }
 0x351   :  { %v846_v37 = vpop.f32.mrf.mxu1 }
 0x352   :  { %v847_v41 = vadd.f32 %v1169_v36, %v846_v37 }
 0x354   :  { %v850_v42 = vmax.f32 %v847_v41, 0.0 }
 0x356   :  { %v851_v46 = vpack.c.bf16 %v850_v42, %v850_v42 }
 0x358   :  { %970 = vmatmul.msk.bf16.vlgmr.msrb.gmra.mxu2 %vm182_vm14, %v851_v46 }
 0x359   :  { %v848_v47 = vpop.f32.mrf.mxu1 }
 0x3db   :  { %v874_v56 = vpop.f32.mrf.mxu2 }
 0x3dc   :  { %v875_v60 = vadd.f32 %v1170_v26, %v874_v56 }
 0x3de   :  { %v879_v62 = vadd.f32 %v878_v55, %v875_v60 }
 0x3e0   :  { %v880_v63 = vmul.f32 0.5, %v879_v62 }
 0x3e2   :  { %v882_v6 = vsel %vm881_vm11, %v880_v63, -inf }
 0x3e3   :  { %v876_v61 = vpop.f32.mrf.mxu2  ;;  %883 = vmax.xlane.f32.xlu1 %v882_v6 }
 0x456   :  { %v884_v7 = vpop.xlane.xlu1 %883 }
 0x457   :  { %v885_v8 = vsub.f32 %v880_v63, %v884_v7 }
 0x459   :  { %v886_v3 = vmul.f32 1.442695, %v885_v8 }
 0x45b   :  { %1175 = vpow2.f32 %v886_v3 }
 0x461   :  { %v1176_v44 = vpop.eup %1175 }
 0x462   :  { %v888_v38 = vsel %vm881_vm11, %v1176_v44, 0.0 }
 0x463   :  { %889 = vadd.xlane.f32.xlu2 %v888_v38 }
 0x4d6   :  { %v890_v10 = vpop.xlane.xlu2 %889 }
 0x4d7   :  { %1177 = vrcp.f32 %v890_v10 }
 0x4dd   :  { %v1178_v25 = vpop.eup %1177 }
 0x4de   :  { %v892_v53 = vmul.f32 %v1178_v25, %v1176_v44 }
 0x4e0   :  { %893 = vst.msk [vmem:[#allocation3] sm:$0x3] %vm881_vm11, %v892_v53 }
 0x4e1   :  { %904 = dma.vmem_to_hbm [thread:$0]  %s900_s8, 32, %s902_s11, [#allocation4]  }
 0x4e2   :  { %1203 = dma.done.wait [#allocation4], 32  }
 0x4e3   :  { %1204 = vsyncadd [#allocation4], 4294967264 }
 0x4e4   :  { %909 = vsyncpa [#allocation4], 1 }

</bundles_post_ra>
